<compile_context>
chip_gen: v7x
topology: tpu7x:2x2x1
jax: 0.10.0
libtpu: 0.0.40
codegen_flags: <defaults>
</compile_context>

<pallas_src>
import math
import jax
import jax.numpy as jnp
from jax.experimental import pallas as pl
from jax.experimental.pallas import tpu as pltpu

B = 16                      # total batch per call
B_BLK = 8                   # batch rows per grid step (one block per TensorCore on v7x)
T, E = 8, 16                # seq len, embed dim
H = 32                      # hidden_size (bidirect=False)
NH = 4                      # nhead
HD = H // NH                # head dim
NC = 4                      # num_classes
NUM_LAYERS = 2              # LSTM layers
BN_EPS = 1e-5


def _lstm_cell(gates, c):
    """One LSTM cell update.  `gates` is the full [B, 4H] pre-activation row; the x2
    required by tanh(g) = 2*sigmoid(2g) - 1 is pre-baked into the g-columns of the
    weights/bias, so a single full-row sigmoid is the only EUP op on the gate path."""
    sig = jax.nn.sigmoid(gates)
    i = sig[:, 0:H]
    f = sig[:, H:2 * H]
    g = 2.0 * sig[:, 2 * H:3 * H] - 1.0        # == tanh(raw g)
    o = sig[:, 3 * H:4 * H]
    c_new = f * c + i * g
    h_new = o * jnp.tanh(c_new)
    return h_new, c_new


def fused_kernel(x_ref,
                 wih1_ref, whh1_ref, b1_ref,
                 wih2_ref, whh2_ref, b2_ref,
                 wq_ref, bq_ref, wkv_ref, bkv_ref,
                 wo_ref, bo_ref, wfc_ref, bfc_ref,
                 gsum_ref, gbc_ref,
                 out_ref):
    f32 = jnp.float32
    bf16 = jnp.bfloat16
    Bb = x_ref.shape[1]                         # x is time-major [T, B, E]

    whh1 = whh1_ref[...]
    wih2 = wih2_ref[...]
    whh2 = whh2_ref[...]
    b2 = b2_ref[...]

    # Layer-1 input projection for all T, hoisted off the recurrence
    # (one [T*B, E] x [E, 4H] bf16 matmul, f32 accumulation).
    xw1 = (jnp.dot(x_ref[...].reshape(T * Bb, E).astype(bf16), wih1_ref[...],
                   preferred_element_type=f32)
           + b1_ref[...]).reshape(T, Bb, 4 * H)

    # Wavefront-interleaved 2-layer LSTM (statically unrolled, T=8).  Layer-2 step t
    # only depends on h1_t and h2_{t-1}; layer-1 step t+1 only on h1_t/c1_t, so the
    # scheduler can overlap them — the critical chain is ~T+1 recurrence steps.
    # Hidden states live in registers; no VMEM scratch stores or reloads.
    h1 = jnp.zeros((Bb, H), f32)
    c1 = jnp.zeros((Bb, H), f32)
    h2 = jnp.zeros((Bb, H), f32)
    c2 = jnp.zeros((Bb, H), f32)
    h2_steps = []
    for t in range(T):
        g1 = xw1[t] + jnp.dot(h1.astype(bf16), whh1, preferred_element_type=f32)
        h1, c1 = _lstm_cell(g1, c1)
        g2 = (jnp.dot(h1.astype(bf16), wih2, preferred_element_type=f32) + b2
              + jnp.dot(h2.astype(bf16), whh2, preferred_element_type=f32))
        h2, c2 = _lstm_cell(g2, c2)
        h2_steps.append(h2)

    # ---- MultiheadAttention (eval BatchNorm + 1/sqrt(HD) folded into weights) ----
    # fc only reads out[:, -1, :], so Q is needed for the last time step only;
    # K/V for all T come from ONE stacked [T*B, H] x [H, 2H] matmul.
    h2_all = jnp.concatenate(h2_steps, axis=0)                        # [T*B, H]
    q = (jnp.dot(h2.astype(bf16), wq_ref[...], preferred_element_type=f32)
         + bq_ref[...])                                               # [B, H]
    kv = (jnp.dot(h2_all.astype(bf16), wkv_ref[...], preferred_element_type=f32)
          + bkv_ref[...]).reshape(T, Bb, 2 * H)
    k_all = kv[:, :, 0:H]                                             # [T, B, H]
    v_all = kv[:, :, H:2 * H]                                         # [T, B, H]

    # All-head scores in one multiply + one head-group-sum matmul, ONE softmax
    # (single exp + approx reciprocal) over all heads, one lane-dense ctx assembly,
    # and a single [B,H] x [H,H] out-projection matmul (no per-head loop).
    prod = q.reshape(1, Bb, H) * k_all                                # [T, B, H]
    s = jnp.dot(prod.reshape(T * Bb, H), gsum_ref[...],
                preferred_element_type=f32).reshape(T, Bb, NH)        # [T, B, NH]
    m = jnp.max(s, axis=0, keepdims=True)
    p = jnp.exp(s - m)
    attn = p * pl.reciprocal(jnp.sum(p, axis=0, keepdims=True), approx=True)
    attn_full = jnp.dot(attn.reshape(T * Bb, NH), gbc_ref[...],
                        preferred_element_type=f32).reshape(T, Bb, H)
    ctx = jnp.sum(attn_full * v_all, axis=0)                          # [B, H] lane-dense

    attn_out = (jnp.dot(ctx.astype(bf16), wo_ref[...], preferred_element_type=f32)
                + bo_ref[...])                                        # [B, H]

    # ---------------- fc on the last time step ----------------
    out_ref[...] = (jnp.dot(attn_out.astype(bf16), wfc_ref[...],
                            preferred_element_type=f32)
                    + bfc_ref[...])


def lstm_mha_forward(x, params):
    """x: [B, T, E] batch-first (module interface).  Internally time-major so every
    per-step slab inside the kernel is a full leading-index tile (no strided slices)."""
    x_tm = jnp.transpose(x, (1, 0, 2))                                # [T, B, E]

    def const_spec(shape):
        zeros = (0,) * len(shape)
        return pl.BlockSpec(shape, lambda i, _z=zeros: _z)

    in_specs = ([pl.BlockSpec((T, B_BLK, E), lambda i: (0, i, 0))]
                + [const_spec(p.shape) for p in params])
    return pl.pallas_call(
        fused_kernel,
        out_shape=jax.ShapeDtypeStruct((x.shape[0], NC), jnp.float32),
        grid=(x.shape[0] // B_BLK,),
        in_specs=in_specs,
        out_specs=pl.BlockSpec((B_BLK, NC), lambda i: (i, 0)),
        compiler_params=pltpu.CompilerParams(
            dimension_semantics=("parallel",)),     # second TC on v7x; harmless on v5e/v6e
    )(x_tm, *params)


if __name__ == "__main__":
    key = jax.random.PRNGKey(0)
    keys = jax.random.split(key, 32)
    _ki = iter(keys)

    def rnd(shape, s=0.1):
        return jax.random.normal(next(_ki), shape, dtype=jnp.float32) * s

    # Input (datatype not in ['word','wordprd'] -> float features, batch-first)
    x = rnd((B, T, E), 1.0)

    # LSTM parameters (PyTorch layout: W_ih [4H, E_in], W_hh [4H, H], biases [4H]).
    # Pre-transpose for right-multiplication, fuse the two biases, bake the x2 of
    # tanh(g) = 2*sigmoid(2g) - 1 into the g-gate columns, cast weights to bf16.
    g_cols = jnp.concatenate([jnp.ones((2 * H,), jnp.float32),
                              2.0 * jnp.ones((H,), jnp.float32),
                              jnp.ones((H,), jnp.float32)])           # [4H], i|f|g|o
    lstm_params = []
    e_in = E
    for _l in range(NUM_LAYERS):
        w_ih = rnd((4 * H, e_in))
        w_hh = rnd((4 * H, H))
        b_ih = rnd((4 * H,))
        b_hh = rnd((4 * H,))
        wih = (w_ih.T * g_cols[None, :]).astype(jnp.bfloat16)
        whh = (w_hh.T * g_cols[None, :]).astype(jnp.bfloat16)
        b = ((b_ih + b_hh) * g_cols).reshape(1, 4 * H)
        lstm_params.append((wih, whh, b))
        e_in = H
    (wih1, whh1, b1), (wih2, whh2, b2) = lstm_params

    # BatchNorm1d (eval): fresh running stats (mean=0, var=1), affine params random.
    gamma = rnd((H,), 0.5) + 1.0
    beta = rnd((H,))
    running_mean = jnp.zeros((H,), jnp.float32)
    running_var = jnp.ones((H,), jnp.float32)
    inv_std = gamma / jnp.sqrt(running_var + BN_EPS)
    bn_scale = inv_std                          # per-H-channel scale
    bn_shift = beta - running_mean * inv_std    # per-H-channel shift

    # nn.MultiheadAttention: in_proj_weight [3H, H] split q/k/v, out_proj [H, H].
    # Fold the eval-mode BatchNorm affine and the 1/sqrt(HD) query scale into the
    # projections:  (h*s + t) @ W + b == h @ (s[:,None]*W) + (t @ W + b)
    in_proj_w = rnd((3 * H, H))
    in_proj_b = rnd((3 * H,))

    def fold(w_rowmajor, b):
        w_t = w_rowmajor.T                      # [H_in, H_out]
        return bn_scale[:, None] * w_t, b + bn_shift @ w_t

    scale = 1.0 / math.sqrt(HD)
    wq, bq = fold(in_proj_w[0:H], in_proj_b[0:H])
    wq, bq = wq * scale, bq * scale
    wk, bk = fold(in_proj_w[H:2 * H], in_proj_b[H:2 * H])
    wv, bv = fold(in_proj_w[2 * H:3 * H], in_proj_b[2 * H:3 * H])
    wq = wq.astype(jnp.bfloat16)
    bq = bq.reshape(1, H)
    wkv = jnp.concatenate([wk, wv], axis=1).astype(jnp.bfloat16)      # [H, 2H]
    bkv = jnp.concatenate([bk, bv]).reshape(1, 2 * H)                 # [1, 2H]

    out_proj_w = rnd((H, H))
    out_proj_b = rnd((H,))
    wo = out_proj_w.T.astype(jnp.bfloat16)
    bo = out_proj_b.reshape(1, H)

    # fc: Linear(H, num_classes)
    fc_w = rnd((NC, H))
    fc_b = rnd((NC,))
    wfc = fc_w.T.astype(jnp.bfloat16)
    bfc = fc_b.reshape(1, NC)

    # Head-group sum / broadcast matrices for the fused all-head attention.
    gsum = (jnp.arange(H)[:, None] // HD
            == jnp.arange(NH)[None, :]).astype(jnp.float32)           # [H, NH]
    gbc = gsum.T                                                      # [NH, H]

    # TODO(synk): the nn.Embedding (datatype in ['word','wordprd']) and
    # TransformerEncoder (attentionforce=True) branches are not exercised by
    # this config and are not implemented.
    params = (wih1, whh1, b1, wih2, whh2, b2,
              wq, bq, wkv, bkv, wo, bo, wfc, bfc, gsum, gbc)

    logits = lstm_mha_forward(x, params)
    logits = jax.block_until_ready(logits)
    assert logits.shape == (B, NC)
    assert bool(jnp.all(jnp.isfinite(logits)))
    print("KERNEL_OK")
</pallas_src>

<mosaic_0001>
module attributes {stable_mosaic.version = 11 : i64} {
  func.func @fused_kernel(%arg0: i32, %arg1: memref<8x8x16xf32, #tpu.memory_space<vmem>>, %arg2: memref<16x128xbf16, #tpu.memory_space<vmem>>, %arg3: memref<32x128xbf16, #tpu.memory_space<vmem>>, %arg4: memref<1x128xf32, #tpu.memory_space<vmem>>, %arg5: memref<32x128xbf16, #tpu.memory_space<vmem>>, %arg6: memref<32x128xbf16, #tpu.memory_space<vmem>>, %arg7: memref<1x128xf32, #tpu.memory_space<vmem>>, %arg8: memref<32x32xbf16, #tpu.memory_space<vmem>>, %arg9: memref<1x32xf32, #tpu.memory_space<vmem>>, %arg10: memref<32x64xbf16, #tpu.memory_space<vmem>>, %arg11: memref<1x64xf32, #tpu.memory_space<vmem>>, %arg12: memref<32x32xbf16, #tpu.memory_space<vmem>>, %arg13: memref<1x32xf32, #tpu.memory_space<vmem>>, %arg14: memref<32x4xbf16, #tpu.memory_space<vmem>>, %arg15: memref<1x4xf32, #tpu.memory_space<vmem>>, %arg16: memref<32x4xf32, #tpu.memory_space<vmem>>, %arg17: memref<4x32xf32, #tpu.memory_space<vmem>>, %arg18: memref<8x4xf32, #tpu.memory_space<vmem>>) attributes {dimension_semantics = [#tpu.dimension_semantics<parallel>], iteration_bounds = array<i64: 2>, scalar_prefetch = 0 : i64, scratch_operands = 0 : i64, tpu.core_type = #tpu.core_type<tc>, window_params = [{transform_indices = @transform_0, window_bounds = array<i64: 8, 8, 16>}, {pipeline_mode = #tpu.pipeline_mode<synchronous>, transform_indices = @transform_1, window_bounds = array<i64: 16, 128>}, {pipeline_mode = #tpu.pipeline_mode<synchronous>, transform_indices = @transform_2, window_bounds = array<i64: 32, 128>}, {pipeline_mode = #tpu.pipeline_mode<synchronous>, transform_indices = @transform_3, window_bounds = array<i64: 1, 128>}, {pipeline_mode = #tpu.pipeline_mode<synchronous>, transform_indices = @transform_4, window_bounds = array<i64: 32, 128>}, {pipeline_mode = #tpu.pipeline_mode<synchronous>, transform_indices = @transform_5, window_bounds = array<i64: 32, 128>}, {pipeline_mode = #tpu.pipeline_mode<synchronous>, transform_indices = @transform_6, window_bounds = array<i64: 1, 128>}, {pipeline_mode = #tpu.pipeline_mode<synchronous>, transform_indices = @transform_7, window_bounds = array<i64: 32, 32>}, {pipeline_mode = #tpu.pipeline_mode<synchronous>, transform_indices = @transform_8, window_bounds = array<i64: 1, 32>}, {pipeline_mode = #tpu.pipeline_mode<synchronous>, transform_indices = @transform_9, window_bounds = array<i64: 32, 64>}, {pipeline_mode = #tpu.pipeline_mode<synchronous>, transform_indices = @transform_10, window_bounds = array<i64: 1, 64>}, {pipeline_mode = #tpu.pipeline_mode<synchronous>, transform_indices = @transform_11, window_bounds = array<i64: 32, 32>}, {pipeline_mode = #tpu.pipeline_mode<synchronous>, transform_indices = @transform_12, window_bounds = array<i64: 1, 32>}, {pipeline_mode = #tpu.pipeline_mode<synchronous>, transform_indices = @transform_13, window_bounds = array<i64: 32, 4>}, {pipeline_mode = #tpu.pipeline_mode<synchronous>, transform_indices = @transform_14, window_bounds = array<i64: 1, 4>}, {pipeline_mode = #tpu.pipeline_mode<synchronous>, transform_indices = @transform_15, window_bounds = array<i64: 32, 4>}, {pipeline_mode = #tpu.pipeline_mode<synchronous>, transform_indices = @transform_16, window_bounds = array<i64: 4, 32>}, {transform_indices = @transform_17, window_bounds = array<i64: 8, 4>}]} {
    %c0 = arith.constant 0 : index
    %c0_0 = arith.constant 0 : index
    %0 = vector.load %arg3[%c0, %c0_0] : memref<32x128xbf16, #tpu.memory_space<vmem>>, vector<32x128xbf16>
    %c0_1 = arith.constant 0 : index
    %c0_2 = arith.constant 0 : index
    %1 = vector.load %arg5[%c0_1, %c0_2] : memref<32x128xbf16, #tpu.memory_space<vmem>>, vector<32x128xbf16>
    %c0_3 = arith.constant 0 : index
    %c0_4 = arith.constant 0 : index
    %2 = vector.load %arg6[%c0_3, %c0_4] : memref<32x128xbf16, #tpu.memory_space<vmem>>, vector<32x128xbf16>
    %c0_5 = arith.constant 0 : index
    %c0_6 = arith.constant 0 : index
    %3 = vector.load %arg7[%c0_5, %c0_6] : memref<1x128xf32, #tpu.memory_space<vmem>>, vector<1x128xf32>
    %c0_7 = arith.constant 0 : index
    %c0_8 = arith.constant 0 : index
    %c0_9 = arith.constant 0 : index
    %4 = vector.load %arg1[%c0_7, %c0_8, %c0_9] : memref<8x8x16xf32, #tpu.memory_space<vmem>>, vector<8x8x16xf32>
    %5 = vector.shape_cast %4 : vector<8x8x16xf32> to vector<64x16xf32>
    %6 = arith.truncf %5 : vector<64x16xf32> to vector<64x16xbf16>
    %c0_10 = arith.constant 0 : index
    %c0_11 = arith.constant 0 : index
    %7 = vector.load %arg2[%c0_10, %c0_11] : memref<16x128xbf16, #tpu.memory_space<vmem>>, vector<16x128xbf16>
    %cst = arith.constant dense<0.000000e+00> : vector<64x128xf32>
    %8 = tpu.matmul %6, %7, %cst {dimension_numbers = #tpu.dot_dimension_numbers<[1], [0], [0], [1], [0, 0, 1, 1], [], []>} : vector<64x16xbf16>, vector<16x128xbf16>, vector<64x128xf32> -> vector<64x128xf32>
    %c0_12 = arith.constant 0 : index
    %c0_13 = arith.constant 0 : index
    %9 = vector.load %arg4[%c0_12, %c0_13] : memref<1x128xf32, #tpu.memory_space<vmem>>, vector<1x128xf32>
    %10 = vector.broadcast %9 : vector<1x128xf32> to vector<64x128xf32>
    %11 = arith.addf %8, %10 : vector<64x128xf32>
    %12 = vector.shape_cast %11 : vector<64x128xf32> to vector<8x8x128xf32>
    %cst_14 = arith.constant 0.000000e+00 : f32
    %13 = vector.broadcast %cst_14 : f32 to vector<8x32xf32>
    %cst_15 = arith.constant 0.000000e+00 : f32
    %14 = vector.broadcast %cst_15 : f32 to vector<8x32xf32>
    %cst_16 = arith.constant 0.000000e+00 : f32
    %15 = vector.broadcast %cst_16 : f32 to vector<8x32xf32>
    %cst_17 = arith.constant 0.000000e+00 : f32
    %16 = vector.broadcast %cst_17 : f32 to vector<8x32xf32>
    %17 = vector.extract_strided_slice %12 {offsets = [0, 0, 0], sizes = [1, 8, 128], strides = [1, 1, 1]} : vector<8x8x128xf32> to vector<1x8x128xf32>
    %18 = vector.shape_cast %17 : vector<1x8x128xf32> to vector<8x128xf32>
    %19 = arith.truncf %13 : vector<8x32xf32> to vector<8x32xbf16>
    %cst_18 = arith.constant dense<0.000000e+00> : vector<8x128xf32>
    %20 = tpu.matmul %19, %0, %cst_18 {dimension_numbers = #tpu.dot_dimension_numbers<[1], [0], [0], [1], [0, 0, 1, 1], [], []>} : vector<8x32xbf16>, vector<32x128xbf16>, vector<8x128xf32> -> vector<8x128xf32>
    %21 = arith.addf %18, %20 : vector<8x128xf32>
    %22 = arith.negf %21 : vector<8x128xf32>
    %23 = math.exp %22 : vector<8x128xf32>
    %cst_19 = arith.constant 1.000000e+00 : f32
    %24 = vector.broadcast %cst_19 : f32 to vector<8x128xf32>
    %25 = arith.addf %24, %23 : vector<8x128xf32>
    %26 = arith.divf %24, %25 : vector<8x128xf32>
    %27 = vector.extract_strided_slice %26 {offsets = [0, 0], sizes = [8, 32], strides = [1, 1]} : vector<8x128xf32> to vector<8x32xf32>
    %28 = vector.extract_strided_slice %26 {offsets = [0, 32], sizes = [8, 32], strides = [1, 1]} : vector<8x128xf32> to vector<8x32xf32>
    %29 = vector.extract_strided_slice %26 {offsets = [0, 64], sizes = [8, 32], strides = [1, 1]} : vector<8x128xf32> to vector<8x32xf32>
    %cst_20 = arith.constant 2.000000e+00 : f32
    %30 = vector.broadcast %cst_20 : f32 to vector<8x32xf32>
    %31 = arith.mulf %30, %29 : vector<8x32xf32>
    %cst_21 = arith.constant 1.000000e+00 : f32
    %32 = vector.broadcast %cst_21 : f32 to vector<8x32xf32>
    %33 = arith.subf %31, %32 : vector<8x32xf32>
    %34 = vector.extract_strided_slice %26 {offsets = [0, 96], sizes = [8, 32], strides = [1, 1]} : vector<8x128xf32> to vector<8x32xf32>
    %35 = arith.mulf %28, %14 : vector<8x32xf32>
    %36 = arith.mulf %27, %33 : vector<8x32xf32>
    %37 = arith.addf %35, %36 : vector<8x32xf32>
    %38 = math.tanh %37 : vector<8x32xf32>
    %39 = arith.mulf %34, %38 : vector<8x32xf32>
    %40 = arith.truncf %39 : vector<8x32xf32> to vector<8x32xbf16>
    %cst_22 = arith.constant dense<0.000000e+00> : vector<8x128xf32>
    %41 = tpu.matmul %40, %1, %cst_22 {dimension_numbers = #tpu.dot_dimension_numbers<[1], [0], [0], [1], [0, 0, 1, 1], [], []>} : vector<8x32xbf16>, vector<32x128xbf16>, vector<8x128xf32> -> vector<8x128xf32>
    %42 = vector.broadcast %3 : vector<1x128xf32> to vector<8x128xf32>
    %43 = arith.addf %41, %42 : vector<8x128xf32>
    %44 = arith.truncf %15 : vector<8x32xf32> to vector<8x32xbf16>
    %cst_23 = arith.constant dense<0.000000e+00> : vector<8x128xf32>
    %45 = tpu.matmul %44, %2, %cst_23 {dimension_numbers = #tpu.dot_dimension_numbers<[1], [0], [0], [1], [0, 0, 1, 1], [], []>} : vector<8x32xbf16>, vector<32x128xbf16>, vector<8x128xf32> -> vector<8x128xf32>
    %46 = arith.addf %43, %45 : vector<8x128xf32>
    %47 = arith.negf %46 : vector<8x128xf32>
    %48 = math.exp %47 : vector<8x128xf32>
    %cst_24 = arith.constant 1.000000e+00 : f32
    %49 = vector.broadcast %cst_24 : f32 to vector<8x128xf32>
    %50 = arith.addf %49, %48 : vector<8x128xf32>
    %51 = arith.divf %49, %50 : vector<8x128xf32>
    %52 = vector.extract_strided_slice %51 {offsets = [0, 0], sizes = [8, 32], strides = [1, 1]} : vector<8x128xf32> to vector<8x32xf32>
    %53 = vector.extract_strided_slice %51 {offsets = [0, 32], sizes = [8, 32], strides = [1, 1]} : vector<8x128xf32> to vector<8x32xf32>
    %54 = vector.extract_strided_slice %51 {offsets = [0, 64], sizes = [8, 32], strides = [1, 1]} : vector<8x128xf32> to vector<8x32xf32>
    %cst_25 = arith.constant 2.000000e+00 : f32
    %55 = vector.broadcast %cst_25 : f32 to vector<8x32xf32>
    %56 = arith.mulf %55, %54 : vector<8x32xf32>
    %cst_26 = arith.constant 1.000000e+00 : f32
    %57 = vector.broadcast %cst_26 : f32 to vector<8x32xf32>
    %58 = arith.subf %56, %57 : vector<8x32xf32>
    %59 = vector.extract_strided_slice %51 {offsets = [0, 96], sizes = [8, 32], strides = [1, 1]} : vector<8x128xf32> to vector<8x32xf32>
    %60 = arith.mulf %53, %16 : vector<8x32xf32>
    %61 = arith.mulf %52, %58 : vector<8x32xf32>
    %62 = arith.addf %60, %61 : vector<8x32xf32>
    %63 = math.tanh %62 : vector<8x32xf32>
    %64 = arith.mulf %59, %63 : vector<8x32xf32>
    %65 = vector.extract_strided_slice %12 {offsets = [1, 0, 0], sizes = [1, 8, 128], strides = [1, 1, 1]} : vector<8x8x128xf32> to vector<1x8x128xf32>
    %66 = vector.shape_cast %65 : vector<1x8x128xf32> to vector<8x128xf32>
    %67 = arith.truncf %39 : vector<8x32xf32> to vector<8x32xbf16>
    %cst_27 = arith.constant dense<0.000000e+00> : vector<8x128xf32>
    %68 = tpu.matmul %67, %0, %cst_27 {dimension_numbers = #tpu.dot_dimension_numbers<[1], [0], [0], [1], [0, 0, 1, 1], [], []>} : vector<8x32xbf16>, vector<32x128xbf16>, vector<8x128xf32> -> vector<8x128xf32>
    %69 = arith.addf %66, %68 : vector<8x128xf32>
    %70 = arith.negf %69 : vector<8x128xf32>
    %71 = math.exp %70 : vector<8x128xf32>
    %cst_28 = arith.constant 1.000000e+00 : f32
    %72 = vector.broadcast %cst_28 : f32 to vector<8x128xf32>
    %73 = arith.addf %72, %71 : vector<8x128xf32>
    %74 = arith.divf %72, %73 : vector<8x128xf32>
    %75 = vector.extract_strided_slice %74 {offsets = [0, 0], sizes = [8, 32], strides = [1, 1]} : vector<8x128xf32> to vector<8x32xf32>
    %76 = vector.extract_strided_slice %74 {offsets = [0, 32], sizes = [8, 32], strides = [1, 1]} : vector<8x128xf32> to vector<8x32xf32>
    %77 = vector.extract_strided_slice %74 {offsets = [0, 64], sizes = [8, 32], strides = [1, 1]} : vector<8x128xf32> to vector<8x32xf32>
    %cst_29 = arith.constant 2.000000e+00 : f32
    %78 = vector.broadcast %cst_29 : f32 to vector<8x32xf32>
    %79 = arith.mulf %78, %77 : vector<8x32xf32>
    %cst_30 = arith.constant 1.000000e+00 : f32
    %80 = vector.broadcast %cst_30 : f32 to vector<8x32xf32>
    %81 = arith.subf %79, %80 : vector<8x32xf32>
    %82 = vector.extract_strided_slice %74 {offsets = [0, 96], sizes = [8, 32], strides = [1, 1]} : vector<8x128xf32> to vector<8x32xf32>
    %83 = arith.mulf %76, %37 : vector<8x32xf32>
    %84 = arith.mulf %75, %81 : vector<8x32xf32>
    %85 = arith.addf %83, %84 : vector<8x32xf32>
    %86 = math.tanh %85 : vector<8x32xf32>
    %87 = arith.mulf %82, %86 : vector<8x32xf32>
    %88 = arith.truncf %87 : vector<8x32xf32> to vector<8x32xbf16>
    %cst_31 = arith.constant dense<0.000000e+00> : vector<8x128xf32>
    %89 = tpu.matmul %88, %1, %cst_31 {dimension_numbers = #tpu.dot_dimension_numbers<[1], [0], [0], [1], [0, 0, 1, 1], [], []>} : vector<8x32xbf16>, vector<32x128xbf16>, vector<8x128xf32> -> vector<8x128xf32>
    %90 = vector.broadcast %3 : vector<1x128xf32> to vector<8x128xf32>
    %91 = arith.addf %89, %90 : vector<8x128xf32>
    %92 = arith.truncf %64 : vector<8x32xf32> to vector<8x32xbf16>
    %cst_32 = arith.constant dense<0.000000e+00> : vector<8x128xf32>
    %93 = tpu.matmul %92, %2, %cst_32 {dimension_numbers = #tpu.dot_dimension_numbers<[1], [0], [0], [1], [0, 0, 1, 1], [], []>} : vector<8x32xbf16>, vector<32x128xbf16>, vector<8x128xf32> -> vector<8x128xf32>
    %94 = arith.addf %91, %93 : vector<8x128xf32>
    %95 = arith.negf %94 : vector<8x128xf32>
    %96 = math.exp %95 : vector<8x128xf32>
    %cst_33 = arith.constant 1.000000e+00 : f32
    %97 = vector.broadcast %cst_33 : f32 to vector<8x128xf32>
    %98 = arith.addf %97, %96 : vector<8x128xf32>
    %99 = arith.divf %97, %98 : vector<8x128xf32>
    %100 = vector.extract_strided_slice %99 {offsets = [0, 0], sizes = [8, 32], strides = [1, 1]} : vector<8x128xf32> to vector<8x32xf32>
    %101 = vector.extract_strided_slice %99 {offsets = [0, 32], sizes = [8, 32], strides = [1, 1]} : vector<8x128xf32> to vector<8x32xf32>
    %102 = vector.extract_strided_slice %99 {offsets = [0, 64], sizes = [8, 32], strides = [1, 1]} : vector<8x128xf32> to vector<8x32xf32>
    %cst_34 = arith.constant 2.000000e+00 : f32
    %103 = vector.broadcast %cst_34 : f32 to vector<8x32xf32>
    %104 = arith.mulf %103, %102 : vector<8x32xf32>
    %cst_35 = arith.constant 1.000000e+00 : f32
    %105 = vector.broadcast %cst_35 : f32 to vector<8x32xf32>
    %106 = arith.subf %104, %105 : vector<8x32xf32>
    %107 = vector.extract_strided_slice %99 {offsets = [0, 96], sizes = [8, 32], strides = [1, 1]} : vector<8x128xf32> to vector<8x32xf32>
    %108 = arith.mulf %101, %62 : vector<8x32xf32>
    %109 = arith.mulf %100, %106 : vector<8x32xf32>
    %110 = arith.addf %108, %109 : vector<8x32xf32>
    %111 = math.tanh %110 : vector<8x32xf32>
    %112 = arith.mulf %107, %111 : vector<8x32xf32>
    %113 = vector.extract_strided_slice %12 {offsets = [2, 0, 0], sizes = [1, 8, 128], strides = [1, 1, 1]} : vector<8x8x128xf32> to vector<1x8x128xf32>
    %114 = vector.shape_cast %113 : vector<1x8x128xf32> to vector<8x128xf32>
    %115 = arith.truncf %87 : vector<8x32xf32> to vector<8x32xbf16>
    %cst_36 = arith.constant dense<0.000000e+00> : vector<8x128xf32>
    %116 = tpu.matmul %115, %0, %cst_36 {dimension_numbers = #tpu.dot_dimension_numbers<[1], [0], [0], [1], [0, 0, 1, 1], [], []>} : vector<8x32xbf16>, vector<32x128xbf16>, vector<8x128xf32> -> vector<8x128xf32>
    %117 = arith.addf %114, %116 : vector<8x128xf32>
    %118 = arith.negf %117 : vector<8x128xf32>
    %119 = math.exp %118 : vector<8x128xf32>
    %cst_37 = arith.constant 1.000000e+00 : f32
    %120 = vector.broadcast %cst_37 : f32 to vector<8x128xf32>
    %121 = arith.addf %120, %119 : vector<8x128xf32>
    %122 = arith.divf %120, %121 : vector<8x128xf32>
    %123 = vector.extract_strided_slice %122 {offsets = [0, 0], sizes = [8, 32], strides = [1, 1]} : vector<8x128xf32> to vector<8x32xf32>
    %124 = vector.extract_strided_slice %122 {offsets = [0, 32], sizes = [8, 32], strides = [1, 1]} : vector<8x128xf32> to vector<8x32xf32>
    %125 = vector.extract_strided_slice %122 {offsets = [0, 64], sizes = [8, 32], strides = [1, 1]} : vector<8x128xf32> to vector<8x32xf32>
    %cst_38 = arith.constant 2.000000e+00 : f32
    %126 = vector.broadcast %cst_38 : f32 to vector<8x32xf32>
    %127 = arith.mulf %126, %125 : vector<8x32xf32>
    %cst_39 = arith.constant 1.000000e+00 : f32
    %128 = vector.broadcast %cst_39 : f32 to vector<8x32xf32>
    %129 = arith.subf %127, %128 : vector<8x32xf32>
    %130 = vector.extract_strided_slice %122 {offsets = [0, 96], sizes = [8, 32], strides = [1, 1]} : vector<8x128xf32> to vector<8x32xf32>
    %131 = arith.mulf %124, %85 : vector<8x32xf32>
    %132 = arith.mulf %123, %129 : vector<8x32xf32>
    %133 = arith.addf %131, %132 : vector<8x32xf32>
    %134 = math.tanh %133 : vector<8x32xf32>
    %135 = arith.mulf %130, %134 : vector<8x32xf32>
    %136 = arith.truncf %135 : vector<8x32xf32> to vector<8x32xbf16>
    %cst_40 = arith.constant dense<0.000000e+00> : vector<8x128xf32>
    %137 = tpu.matmul %136, %1, %cst_40 {dimension_numbers = #tpu.dot_dimension_numbers<[1], [0], [0], [1], [0, 0, 1, 1], [], []>} : vector<8x32xbf16>, vector<32x128xbf16>, vector<8x128xf32> -> vector<8x128xf32>
    %138 = vector.broadcast %3 : vector<1x128xf32> to vector<8x128xf32>
    %139 = arith.addf %137, %138 : vector<8x128xf32>
    %140 = arith.truncf %112 : vector<8x32xf32> to vector<8x32xbf16>
    %cst_41 = arith.constant dense<0.000000e+00> : vector<8x128xf32>
    %141 = tpu.matmul %140, %2, %cst_41 {dimension_numbers = #tpu.dot_dimension_numbers<[1], [0], [0], [1], [0, 0, 1, 1], [], []>} : vector<8x32xbf16>, vector<32x128xbf16>, vector<8x128xf32> -> vector<8x128xf32>
    %142 = arith.addf %139, %141 : vector<8x128xf32>
    %143 = arith.negf %142 : vector<8x128xf32>
    %144 = math.exp %143 : vector<8x128xf32>
    %cst_42 = arith.constant 1.000000e+00 : f32
    %145 = vector.broadcast %cst_42 : f32 to vector<8x128xf32>
    %146 = arith.addf %145, %144 : vector<8x128xf32>
    %147 = arith.divf %145, %146 : vector<8x128xf32>
    %148 = vector.extract_strided_slice %147 {offsets = [0, 0], sizes = [8, 32], strides = [1, 1]} : vector<8x128xf32> to vector<8x32xf32>
    %149 = vector.extract_strided_slice %147 {offsets = [0, 32], sizes = [8, 32], strides = [1, 1]} : vector<8x128xf32> to vector<8x32xf32>
    %150 = vector.extract_strided_slice %147 {offsets = [0, 64], sizes = [8, 32], strides = [1, 1]} : vector<8x128xf32> to vector<8x32xf32>
    %cst_43 = arith.constant 2.000000e+00 : f32
    %151 = vector.broadcast %cst_43 : f32 to vector<8x32xf32>
    %152 = arith.mulf %151, %150 : vector<8x32xf32>
    %cst_44 = arith.constant 1.000000e+00 : f32
    %153 = vector.broadcast %cst_44 : f32 to vector<8x32xf32>
    %154 = arith.subf %152, %153 : vector<8x32xf32>
    %155 = vector.extract_strided_slice %147 {offsets = [0, 96], sizes = [8, 32], strides = [1, 1]} : vector<8x128xf32> to vector<8x32xf32>
    %156 = arith.mulf %149, %110 : vector<8x32xf32>
    %157 = arith.mulf %148, %154 : vector<8x32xf32>
    %158 = arith.addf %156, %157 : vector<8x32xf32>
    %159 = math.tanh %158 : vector<8x32xf32>
    %160 = arith.mulf %155, %159 : vector<8x32xf32>
    %161 = vector.extract_strided_slice %12 {offsets = [3, 0, 0], sizes = [1, 8, 128], strides = [1, 1, 1]} : vector<8x8x128xf32> to vector<1x8x128xf32>
    %162 = vector.shape_cast %161 : vector<1x8x128xf32> to vector<8x128xf32>
    %163 = arith.truncf %135 : vector<8x32xf32> to vector<8x32xbf16>
    %cst_45 = arith.constant dense<0.000000e+00> : vector<8x128xf32>
    %164 = tpu.matmul %163, %0, %cst_45 {dimension_numbers = #tpu.dot_dimension_numbers<[1], [0], [0], [1], [0, 0, 1, 1], [], []>} : vector<8x32xbf16>, vector<32x128xbf16>, vector<8x128xf32> -> vector<8x128xf32>
    %165 = arith.addf %162, %164 : vector<8x128xf32>
    %166 = arith.negf %165 : vector<8x128xf32>
    %167 = math.exp %166 : vector<8x128xf32>
    %cst_46 = arith.constant 1.000000e+00 : f32
    %168 = vector.broadcast %cst_46 : f32 to vector<8x128xf32>
    %169 = arith.addf %168, %167 : vector<8x128xf32>
    %170 = arith.divf %168, %169 : vector<8x128xf32>
    %171 = vector.extract_strided_slice %170 {offsets = [0, 0], sizes = [8, 32], strides = [1, 1]} : vector<8x128xf32> to vector<8x32xf32>
    %172 = vector.extract_strided_slice %170 {offsets = [0, 32], sizes = [8, 32], strides = [1, 1]} : vector<8x128xf32> to vector<8x32xf32>
    %173 = vector.extract_strided_slice %170 {offsets = [0, 64], sizes = [8, 32], strides = [1, 1]} : vector<8x128xf32> to vector<8x32xf32>
    %cst_47 = arith.constant 2.000000e+00 : f32
    %174 = vector.broadcast %cst_47 : f32 to vector<8x32xf32>
    %175 = arith.mulf %174, %173 : vector<8x32xf32>
    %cst_48 = arith.constant 1.000000e+00 : f32
    %176 = vector.broadcast %cst_48 : f32 to vector<8x32xf32>
    %177 = arith.subf %175, %176 : vector<8x32xf32>
    %178 = vector.extract_strided_slice %170 {offsets = [0, 96], sizes = [8, 32], strides = [1, 1]} : vector<8x128xf32> to vector<8x32xf32>
    %179 = arith.mulf %172, %133 : vector<8x32xf32>
    %180 = arith.mulf %171, %177 : vector<8x32xf32>
    %181 = arith.addf %179, %180 : vector<8x32xf32>
    %182 = math.tanh %181 : vector<8x32xf32>
    %183 = arith.mulf %178, %182 : vector<8x32xf32>
    %184 = arith.truncf %183 : vector<8x32xf32> to vector<8x32xbf16>
    %cst_49 = arith.constant dense<0.000000e+00> : vector<8x128xf32>
    %185 = tpu.matmul %184, %1, %cst_49 {dimension_numbers = #tpu.dot_dimension_numbers<[1], [0], [0], [1], [0, 0, 1, 1], [], []>} : vector<8x32xbf16>, vector<32x128xbf16>, vector<8x128xf32> -> vector<8x128xf32>
    %186 = vector.broadcast %3 : vector<1x128xf32> to vector<8x128xf32>
    %187 = arith.addf %185, %186 : vector<8x128xf32>
    %188 = arith.truncf %160 : vector<8x32xf32> to vector<8x32xbf16>
    %cst_50 = arith.constant dense<0.000000e+00> : vector<8x128xf32>
    %189 = tpu.matmul %188, %2, %cst_50 {dimension_numbers = #tpu.dot_dimension_numbers<[1], [0], [0], [1], [0, 0, 1, 1], [], []>} : vector<8x32xbf16>, vector<32x128xbf16>, vector<8x128xf32> -> vector<8x128xf32>
    %190 = arith.addf %187, %189 : vector<8x128xf32>
    %191 = arith.negf %190 : vector<8x128xf32>
    %192 = math.exp %191 : vector<8x128xf32>
    %cst_51 = arith.constant 1.000000e+00 : f32
    %193 = vector.broadcast %cst_51 : f32 to vector<8x128xf32>
    %194 = arith.addf %193, %192 : vector<8x128xf32>
    %195 = arith.divf %193, %194 : vector<8x128xf32>
    %196 = vector.extract_strided_slice %195 {offsets = [0, 0], sizes = [8, 32], strides = [1, 1]} : vector<8x128xf32> to vector<8x32xf32>
    %197 = vector.extract_strided_slice %195 {offsets = [0, 32], sizes = [8, 32], strides = [1, 1]} : vector<8x128xf32> to vector<8x32xf32>
    %198 = vector.extract_strided_slice %195 {offsets = [0, 64], sizes = [8, 32], strides = [1, 1]} : vector<8x128xf32> to vector<8x32xf32>
    %cst_52 = arith.constant 2.000000e+00 : f32
    %199 = vector.broadcast %cst_52 : f32 to vector<8x32xf32>
    %200 = arith.mulf %199, %198 : vector<8x32xf32>
    %cst_53 = arith.constant 1.000000e+00 : f32
    %201 = vector.broadcast %cst_53 : f32 to vector<8x32xf32>
    %202 = arith.subf %200, %201 : vector<8x32xf32>
    %203 = vector.extract_strided_slice %195 {offsets = [0, 96], sizes = [8, 32], strides = [1, 1]} : vector<8x128xf32> to vector<8x32xf32>
    %204 = arith.mulf %197, %158 : vector<8x32xf32>
    %205 = arith.mulf %196, %202 : vector<8x32xf32>
    %206 = arith.addf %204, %205 : vector<8x32xf32>
    %207 = math.tanh %206 : vector<8x32xf32>
    %208 = arith.mulf %203, %207 : vector<8x32xf32>
    %209 = vector.extract_strided_slice %12 {offsets = [4, 0, 0], sizes = [1, 8, 128], strides = [1, 1, 1]} : vector<8x8x128xf32> to vector<1x8x128xf32>
    %210 = vector.shape_cast %209 : vector<1x8x128xf32> to vector<8x128xf32>
    %211 = arith.truncf %183 : vector<8x32xf32> to vector<8x32xbf16>
    %cst_54 = arith.constant dense<0.000000e+00> : vector<8x128xf32>
    %212 = tpu.matmul %211, %0, %cst_54 {dimension_numbers = #tpu.dot_dimension_numbers<[1], [0], [0], [1], [0, 0, 1, 1], [], []>} : vector<8x32xbf16>, vector<32x128xbf16>, vector<8x128xf32> -> vector<8x128xf32>
    %213 = arith.addf %210, %212 : vector<8x128xf32>
    %214 = arith.negf %213 : vector<8x128xf32>
    %215 = math.exp %214 : vector<8x128xf32>
    %cst_55 = arith.constant 1.000000e+00 : f32
    %216 = vector.broadcast %cst_55 : f32 to vector<8x128xf32>
    %217 = arith.addf %216, %215 : vector<8x128xf32>
    %218 = arith.divf %216, %217 : vector<8x128xf32>
    %219 = vector.extract_strided_slice %218 {offsets = [0, 0], sizes = [8, 32], strides = [1, 1]} : vector<8x128xf32> to vector<8x32xf32>
    %220 = vector.extract_strided_slice %218 {offsets = [0, 32], sizes = [8, 32], strides = [1, 1]} : vector<8x128xf32> to vector<8x32xf32>
    %221 = vector.extract_strided_slice %218 {offsets = [0, 64], sizes = [8, 32], strides = [1, 1]} : vector<8x128xf32> to vector<8x32xf32>
    %cst_56 = arith.constant 2.000000e+00 : f32
    %222 = vector.broadcast %cst_56 : f32 to vector<8x32xf32>
    %223 = arith.mulf %222, %221 : vector<8x32xf32>
    %cst_57 = arith.constant 1.000000e+00 : f32
    %224 = vector.broadcast %cst_57 : f32 to vector<8x32xf32>
    %225 = arith.subf %223, %224 : vector<8x32xf32>
    %226 = vector.extract_strided_slice %218 {offsets = [0, 96], sizes = [8, 32], strides = [1, 1]} : vector<8x128xf32> to vector<8x32xf32>
    %227 = arith.mulf %220, %181 : vector<8x32xf32>
    %228 = arith.mulf %219, %225 : vector<8x32xf32>
    %229 = arith.addf %227, %228 : vector<8x32xf32>
    %230 = math.tanh %229 : vector<8x32xf32>
    %231 = arith.mulf %226, %230 : vector<8x32xf32>
    %232 = arith.truncf %231 : vector<8x32xf32> to vector<8x32xbf16>
    %cst_58 = arith.constant dense<0.000000e+00> : vector<8x128xf32>
    %233 = tpu.matmul %232, %1, %cst_58 {dimension_numbers = #tpu.dot_dimension_numbers<[1], [0], [0], [1], [0, 0, 1, 1], [], []>} : vector<8x32xbf16>, vector<32x128xbf16>, vector<8x128xf32> -> vector<8x128xf32>
    %234 = vector.broadcast %3 : vector<1x128xf32> to vector<8x128xf32>
    %235 = arith.addf %233, %234 : vector<8x128xf32>
    %236 = arith.truncf %208 : vector<8x32xf32> to vector<8x32xbf16>
    %cst_59 = arith.constant dense<0.000000e+00> : vector<8x128xf32>
    %237 = tpu.matmul %236, %2, %cst_59 {dimension_numbers = #tpu.dot_dimension_numbers<[1], [0], [0], [1], [0, 0, 1, 1], [], []>} : vector<8x32xbf16>, vector<32x128xbf16>, vector<8x128xf32> -> vector<8x128xf32>
    %238 = arith.addf %235, %237 : vector<8x128xf32>
    %239 = arith.negf %238 : vector<8x128xf32>
    %240 = math.exp %239 : vector<8x128xf32>
    %cst_60 = arith.constant 1.000000e+00 : f32
    %241 = vector.broadcast %cst_60 : f32 to vector<8x128xf32>
    %242 = arith.addf %241, %240 : vector<8x128xf32>
    %243 = arith.divf %241, %242 : vector<8x128xf32>
    %244 = vector.extract_strided_slice %243 {offsets = [0, 0], sizes = [8, 32], strides = [1, 1]} : vector<8x128xf32> to vector<8x32xf32>
    %245 = vector.extract_strided_slice %243 {offsets = [0, 32], sizes = [8, 32], strides = [1, 1]} : vector<8x128xf32> to vector<8x32xf32>
    %246 = vector.extract_strided_slice %243 {offsets = [0, 64], sizes = [8, 32], strides = [1, 1]} : vector<8x128xf32> to vector<8x32xf32>
    %cst_61 = arith.constant 2.000000e+00 : f32
    %247 = vector.broadcast %cst_61 : f32 to vector<8x32xf32>
    %248 = arith.mulf %247, %246 : vector<8x32xf32>
    %cst_62 = arith.constant 1.000000e+00 : f32
    %249 = vector.broadcast %cst_62 : f32 to vector<8x32xf32>
    %250 = arith.subf %248, %249 : vector<8x32xf32>
    %251 = vector.extract_strided_slice %243 {offsets = [0, 96], sizes = [8, 32], strides = [1, 1]} : vector<8x128xf32> to vector<8x32xf32>
    %252 = arith.mulf %245, %206 : vector<8x32xf32>
    %253 = arith.mulf %244, %250 : vector<8x32xf32>
    %254 = arith.addf %252, %253 : vector<8x32xf32>
    %255 = math.tanh %254 : vector<8x32xf32>
    %256 = arith.mulf %251, %255 : vector<8x32xf32>
    %257 = vector.extract_strided_slice %12 {offsets = [5, 0, 0], sizes = [1, 8, 128], strides = [1, 1, 1]} : vector<8x8x128xf32> to vector<1x8x128xf32>
    %258 = vector.shape_cast %257 : vector<1x8x128xf32> to vector<8x128xf32>
    %259 = arith.truncf %231 : vector<8x32xf32> to vector<8x32xbf16>
    %cst_63 = arith.constant dense<0.000000e+00> : vector<8x128xf32>
    %260 = tpu.matmul %259, %0, %cst_63 {dimension_numbers = #tpu.dot_dimension_numbers<[1], [0], [0], [1], [0, 0, 1, 1], [], []>} : vector<8x32xbf16>, vector<32x128xbf16>, vector<8x128xf32> -> vector<8x128xf32>
    %261 = arith.addf %258, %260 : vector<8x128xf32>
    %262 = arith.negf %261 : vector<8x128xf32>
    %263 = math.exp %262 : vector<8x128xf32>
    %cst_64 = arith.constant 1.000000e+00 : f32
    %264 = vector.broadcast %cst_64 : f32 to vector<8x128xf32>
    %265 = arith.addf %264, %263 : vector<8x128xf32>
    %266 = arith.divf %264, %265 : vector<8x128xf32>
    %267 = vector.extract_strided_slice %266 {offsets = [0, 0], sizes = [8, 32], strides = [1, 1]} : vector<8x128xf32> to vector<8x32xf32>
    %268 = vector.extract_strided_slice %266 {offsets = [0, 32], sizes = [8, 32], strides = [1, 1]} : vector<8x128xf32> to vector<8x32xf32>
    %269 = vector.extract_strided_slice %266 {offsets = [0, 64], sizes = [8, 32], strides = [1, 1]} : vector<8x128xf32> to vector<8x32xf32>
    %cst_65 = arith.constant 2.000000e+00 : f32
    %270 = vector.broadcast %cst_65 : f32 to vector<8x32xf32>
    %271 = arith.mulf %270, %269 : vector<8x32xf32>
    %cst_66 = arith.constant 1.000000e+00 : f32
    %272 = vector.broadcast %cst_66 : f32 to vector<8x32xf32>
    %273 = arith.subf %271, %272 : vector<8x32xf32>
    %274 = vector.extract_strided_slice %266 {offsets = [0, 96], sizes = [8, 32], strides = [1, 1]} : vector<8x128xf32> to vector<8x32xf32>
    %275 = arith.mulf %268, %229 : vector<8x32xf32>
    %276 = arith.mulf %267, %273 : vector<8x32xf32>
    %277 = arith.addf %275, %276 : vector<8x32xf32>
    %278 = math.tanh %277 : vector<8x32xf32>
    %279 = arith.mulf %274, %278 : vector<8x32xf32>
    %280 = arith.truncf %279 : vector<8x32xf32> to vector<8x32xbf16>
    %cst_67 = arith.constant dense<0.000000e+00> : vector<8x128xf32>
    %281 = tpu.matmul %280, %1, %cst_67 {dimension_numbers = #tpu.dot_dimension_numbers<[1], [0], [0], [1], [0, 0, 1, 1], [], []>} : vector<8x32xbf16>, vector<32x128xbf16>, vector<8x128xf32> -> vector<8x128xf32>
    %282 = vector.broadcast %3 : vector<1x128xf32> to vector<8x128xf32>
    %283 = arith.addf %281, %282 : vector<8x128xf32>
    %284 = arith.truncf %256 : vector<8x32xf32> to vector<8x32xbf16>
    %cst_68 = arith.constant dense<0.000000e+00> : vector<8x128xf32>
    %285 = tpu.matmul %284, %2, %cst_68 {dimension_numbers = #tpu.dot_dimension_numbers<[1], [0], [0], [1], [0, 0, 1, 1], [], []>} : vector<8x32xbf16>, vector<32x128xbf16>, vector<8x128xf32> -> vector<8x128xf32>
    %286 = arith.addf %283, %285 : vector<8x128xf32>
    %287 = arith.negf %286 : vector<8x128xf32>
    %288 = math.exp %287 : vector<8x128xf32>
    %cst_69 = arith.constant 1.000000e+00 : f32
    %289 = vector.broadcast %cst_69 : f32 to vector<8x128xf32>
    %290 = arith.addf %289, %288 : vector<8x128xf32>
    %291 = arith.divf %289, %290 : vector<8x128xf32>
    %292 = vector.extract_strided_slice %291 {offsets = [0, 0], sizes = [8, 32], strides = [1, 1]} : vector<8x128xf32> to vector<8x32xf32>
    %293 = vector.extract_strided_slice %291 {offsets = [0, 32], sizes = [8, 32], strides = [1, 1]} : vector<8x128xf32> to vector<8x32xf32>
    %294 = vector.extract_strided_slice %291 {offsets = [0, 64], sizes = [8, 32], strides = [1, 1]} : vector<8x128xf32> to vector<8x32xf32>
    %cst_70 = arith.constant 2.000000e+00 : f32
    %295 = vector.broadcast %cst_70 : f32 to vector<8x32xf32>
    %296 = arith.mulf %295, %294 : vector<8x32xf32>
    %cst_71 = arith.constant 1.000000e+00 : f32
    %297 = vector.broadcast %cst_71 : f32 to vector<8x32xf32>
    %298 = arith.subf %296, %297 : vector<8x32xf32>
    %299 = vector.extract_strided_slice %291 {offsets = [0, 96], sizes = [8, 32], strides = [1, 1]} : vector<8x128xf32> to vector<8x32xf32>
    %300 = arith.mulf %293, %254 : vector<8x32xf32>
    %301 = arith.mulf %292, %298 : vector<8x32xf32>
    %302 = arith.addf %300, %301 : vector<8x32xf32>
    %303 = math.tanh %302 : vector<8x32xf32>
    %304 = arith.mulf %299, %303 : vector<8x32xf32>
    %305 = vector.extract_strided_slice %12 {offsets = [6, 0, 0], sizes = [1, 8, 128], strides = [1, 1, 1]} : vector<8x8x128xf32> to vector<1x8x128xf32>
    %306 = vector.shape_cast %305 : vector<1x8x128xf32> to vector<8x128xf32>
    %307 = arith.truncf %279 : vector<8x32xf32> to vector<8x32xbf16>
    %cst_72 = arith.constant dense<0.000000e+00> : vector<8x128xf32>
    %308 = tpu.matmul %307, %0, %cst_72 {dimension_numbers = #tpu.dot_dimension_numbers<[1], [0], [0], [1], [0, 0, 1, 1], [], []>} : vector<8x32xbf16>, vector<32x128xbf16>, vector<8x128xf32> -> vector<8x128xf32>
    %309 = arith.addf %306, %308 : vector<8x128xf32>
    %310 = arith.negf %309 : vector<8x128xf32>
    %311 = math.exp %310 : vector<8x128xf32>
    %cst_73 = arith.constant 1.000000e+00 : f32
    %312 = vector.broadcast %cst_73 : f32 to vector<8x128xf32>
    %313 = arith.addf %312, %311 : vector<8x128xf32>
    %314 = arith.divf %312, %313 : vector<8x128xf32>
    %315 = vector.extract_strided_slice %314 {offsets = [0, 0], sizes = [8, 32], strides = [1, 1]} : vector<8x128xf32> to vector<8x32xf32>
    %316 = vector.extract_strided_slice %314 {offsets = [0, 32], sizes = [8, 32], strides = [1, 1]} : vector<8x128xf32> to vector<8x32xf32>
    %317 = vector.extract_strided_slice %314 {offsets = [0, 64], sizes = [8, 32], strides = [1, 1]} : vector<8x128xf32> to vector<8x32xf32>
    %cst_74 = arith.constant 2.000000e+00 : f32
    %318 = vector.broadcast %cst_74 : f32 to vector<8x32xf32>
    %319 = arith.mulf %318, %317 : vector<8x32xf32>
    %cst_75 = arith.constant 1.000000e+00 : f32
    %320 = vector.broadcast %cst_75 : f32 to vector<8x32xf32>
    %321 = arith.subf %319, %320 : vector<8x32xf32>
    %322 = vector.extract_strided_slice %314 {offsets = [0, 96], sizes = [8, 32], strides = [1, 1]} : vector<8x128xf32> to vector<8x32xf32>
    %323 = arith.mulf %316, %277 : vector<8x32xf32>
    %324 = arith.mulf %315, %321 : vector<8x32xf32>
    %325 = arith.addf %323, %324 : vector<8x32xf32>
    %326 = math.tanh %325 : vector<8x32xf32>
    %327 = arith.mulf %322, %326 : vector<8x32xf32>
    %328 = arith.truncf %327 : vector<8x32xf32> to vector<8x32xbf16>
    %cst_76 = arith.constant dense<0.000000e+00> : vector<8x128xf32>
    %329 = tpu.matmul %328, %1, %cst_76 {dimension_numbers = #tpu.dot_dimension_numbers<[1], [0], [0], [1], [0, 0, 1, 1], [], []>} : vector<8x32xbf16>, vector<32x128xbf16>, vector<8x128xf32> -> vector<8x128xf32>
    %330 = vector.broadcast %3 : vector<1x128xf32> to vector<8x128xf32>
    %331 = arith.addf %329, %330 : vector<8x128xf32>
    %332 = arith.truncf %304 : vector<8x32xf32> to vector<8x32xbf16>
    %cst_77 = arith.constant dense<0.000000e+00> : vector<8x128xf32>
    %333 = tpu.matmul %332, %2, %cst_77 {dimension_numbers = #tpu.dot_dimension_numbers<[1], [0], [0], [1], [0, 0, 1, 1], [], []>} : vector<8x32xbf16>, vector<32x128xbf16>, vector<8x128xf32> -> vector<8x128xf32>
    %334 = arith.addf %331, %333 : vector<8x128xf32>
    %335 = arith.negf %334 : vector<8x128xf32>
    %336 = math.exp %335 : vector<8x128xf32>
    %cst_78 = arith.constant 1.000000e+00 : f32
    %337 = vector.broadcast %cst_78 : f32 to vector<8x128xf32>
    %338 = arith.addf %337, %336 : vector<8x128xf32>
    %339 = arith.divf %337, %338 : vector<8x128xf32>
    %340 = vector.extract_strided_slice %339 {offsets = [0, 0], sizes = [8, 32], strides = [1, 1]} : vector<8x128xf32> to vector<8x32xf32>
    %341 = vector.extract_strided_slice %339 {offsets = [0, 32], sizes = [8, 32], strides = [1, 1]} : vector<8x128xf32> to vector<8x32xf32>
    %342 = vector.extract_strided_slice %339 {offsets = [0, 64], sizes = [8, 32], strides = [1, 1]} : vector<8x128xf32> to vector<8x32xf32>
    %cst_79 = arith.constant 2.000000e+00 : f32
    %343 = vector.broadcast %cst_79 : f32 to vector<8x32xf32>
    %344 = arith.mulf %343, %342 : vector<8x32xf32>
    %cst_80 = arith.constant 1.000000e+00 : f32
    %345 = vector.broadcast %cst_80 : f32 to vector<8x32xf32>
    %346 = arith.subf %344, %345 : vector<8x32xf32>
    %347 = vector.extract_strided_slice %339 {offsets = [0, 96], sizes = [8, 32], strides = [1, 1]} : vector<8x128xf32> to vector<8x32xf32>
    %348 = arith.mulf %341, %302 : vector<8x32xf32>
    %349 = arith.mulf %340, %346 : vector<8x32xf32>
    %350 = arith.addf %348, %349 : vector<8x32xf32>
    %351 = math.tanh %350 : vector<8x32xf32>
    %352 = arith.mulf %347, %351 : vector<8x32xf32>
    %353 = vector.extract_strided_slice %12 {offsets = [7, 0, 0], sizes = [1, 8, 128], strides = [1, 1, 1]} : vector<8x8x128xf32> to vector<1x8x128xf32>
    %354 = vector.shape_cast %353 : vector<1x8x128xf32> to vector<8x128xf32>
    %355 = arith.truncf %327 : vector<8x32xf32> to vector<8x32xbf16>
    %cst_81 = arith.constant dense<0.000000e+00> : vector<8x128xf32>
    %356 = tpu.matmul %355, %0, %cst_81 {dimension_numbers = #tpu.dot_dimension_numbers<[1], [0], [0], [1], [0, 0, 1, 1], [], []>} : vector<8x32xbf16>, vector<32x128xbf16>, vector<8x128xf32> -> vector<8x128xf32>
    %357 = arith.addf %354, %356 : vector<8x128xf32>
    %358 = arith.negf %357 : vector<8x128xf32>
    %359 = math.exp %358 : vector<8x128xf32>
    %cst_82 = arith.constant 1.000000e+00 : f32
    %360 = vector.broadcast %cst_82 : f32 to vector<8x128xf32>
    %361 = arith.addf %360, %359 : vector<8x128xf32>
    %362 = arith.divf %360, %361 : vector<8x128xf32>
    %363 = vector.extract_strided_slice %362 {offsets = [0, 0], sizes = [8, 32], strides = [1, 1]} : vector<8x128xf32> to vector<8x32xf32>
    %364 = vector.extract_strided_slice %362 {offsets = [0, 32], sizes = [8, 32], strides = [1, 1]} : vector<8x128xf32> to vector<8x32xf32>
    %365 = vector.extract_strided_slice %362 {offsets = [0, 64], sizes = [8, 32], strides = [1, 1]} : vector<8x128xf32> to vector<8x32xf32>
    %cst_83 = arith.constant 2.000000e+00 : f32
    %366 = vector.broadcast %cst_83 : f32 to vector<8x32xf32>
    %367 = arith.mulf %366, %365 : vector<8x32xf32>
    %cst_84 = arith.constant 1.000000e+00 : f32
    %368 = vector.broadcast %cst_84 : f32 to vector<8x32xf32>
    %369 = arith.subf %367, %368 : vector<8x32xf32>
    %370 = vector.extract_strided_slice %362 {offsets = [0, 96], sizes = [8, 32], strides = [1, 1]} : vector<8x128xf32> to vector<8x32xf32>
    %371 = arith.mulf %364, %325 : vector<8x32xf32>
    %372 = arith.mulf %363, %369 : vector<8x32xf32>
    %373 = arith.addf %371, %372 : vector<8x32xf32>
    %374 = math.tanh %373 : vector<8x32xf32>
    %375 = arith.mulf %370, %374 : vector<8x32xf32>
    %376 = arith.truncf %375 : vector<8x32xf32> to vector<8x32xbf16>
    %cst_85 = arith.constant dense<0.000000e+00> : vector<8x128xf32>
    %377 = tpu.matmul %376, %1, %cst_85 {dimension_numbers = #tpu.dot_dimension_numbers<[1], [0], [0], [1], [0, 0, 1, 1], [], []>} : vector<8x32xbf16>, vector<32x128xbf16>, vector<8x128xf32> -> vector<8x128xf32>
    %378 = vector.broadcast %3 : vector<1x128xf32> to vector<8x128xf32>
    %379 = arith.addf %377, %378 : vector<8x128xf32>
    %380 = arith.truncf %352 : vector<8x32xf32> to vector<8x32xbf16>
    %cst_86 = arith.constant dense<0.000000e+00> : vector<8x128xf32>
    %381 = tpu.matmul %380, %2, %cst_86 {dimension_numbers = #tpu.dot_dimension_numbers<[1], [0], [0], [1], [0, 0, 1, 1], [], []>} : vector<8x32xbf16>, vector<32x128xbf16>, vector<8x128xf32> -> vector<8x128xf32>
    %382 = arith.addf %379, %381 : vector<8x128xf32>
    %383 = arith.negf %382 : vector<8x128xf32>
    %384 = math.exp %383 : vector<8x128xf32>
    %cst_87 = arith.constant 1.000000e+00 : f32
    %385 = vector.broadcast %cst_87 : f32 to vector<8x128xf32>
    %386 = arith.addf %385, %384 : vector<8x128xf32>
    %387 = arith.divf %385, %386 : vector<8x128xf32>
    %388 = vector.extract_strided_slice %387 {offsets = [0, 0], sizes = [8, 32], strides = [1, 1]} : vector<8x128xf32> to vector<8x32xf32>
    %389 = vector.extract_strided_slice %387 {offsets = [0, 32], sizes = [8, 32], strides = [1, 1]} : vector<8x128xf32> to vector<8x32xf32>
    %390 = vector.extract_strided_slice %387 {offsets = [0, 64], sizes = [8, 32], strides = [1, 1]} : vector<8x128xf32> to vector<8x32xf32>
    %cst_88 = arith.constant 2.000000e+00 : f32
    %391 = vector.broadcast %cst_88 : f32 to vector<8x32xf32>
    %392 = arith.mulf %391, %390 : vector<8x32xf32>
    %cst_89 = arith.constant 1.000000e+00 : f32
    %393 = vector.broadcast %cst_89 : f32 to vector<8x32xf32>
    %394 = arith.subf %392, %393 : vector<8x32xf32>
    %395 = vector.extract_strided_slice %387 {offsets = [0, 96], sizes = [8, 32], strides = [1, 1]} : vector<8x128xf32> to vector<8x32xf32>
    %396 = arith.mulf %389, %350 : vector<8x32xf32>
    %397 = arith.mulf %388, %394 : vector<8x32xf32>
    %398 = arith.addf %396, %397 : vector<8x32xf32>
    %399 = math.tanh %398 : vector<8x32xf32>
    %400 = arith.mulf %395, %399 : vector<8x32xf32>
    %401 = tpu.concatenate %64, %112, %160, %208, %256, %304, %352, %400 in 0 : vector<8x32xf32>, vector<8x32xf32>, vector<8x32xf32>, vector<8x32xf32>, vector<8x32xf32>, vector<8x32xf32>, vector<8x32xf32>, vector<8x32xf32> -> vector<64x32xf32>
    %402 = arith.truncf %400 : vector<8x32xf32> to vector<8x32xbf16>
    %c0_90 = arith.constant 0 : index
    %c0_91 = arith.constant 0 : index
    %403 = vector.load %arg8[%c0_90, %c0_91] : memref<32x32xbf16, #tpu.memory_space<vmem>>, vector<32x32xbf16>
    %cst_92 = arith.constant dense<0.000000e+00> : vector<8x32xf32>
    %404 = tpu.matmul %402, %403, %cst_92 {dimension_numbers = #tpu.dot_dimension_numbers<[1], [0], [0], [1], [0, 0, 1, 1], [], []>} : vector<8x32xbf16>, vector<32x32xbf16>, vector<8x32xf32> -> vector<8x32xf32>
    %c0_93 = arith.constant 0 : index
    %c0_94 = arith.constant 0 : index
    %405 = vector.load %arg9[%c0_93, %c0_94] : memref<1x32xf32, #tpu.memory_space<vmem>>, vector<1x32xf32>
    %406 = vector.broadcast %405 : vector<1x32xf32> to vector<8x32xf32>
    %407 = arith.addf %404, %406 : vector<8x32xf32>
    %408 = arith.truncf %401 : vector<64x32xf32> to vector<64x32xbf16>
    %c0_95 = arith.constant 0 : index
    %c0_96 = arith.constant 0 : index
    %409 = vector.load %arg10[%c0_95, %c0_96] : memref<32x64xbf16, #tpu.memory_space<vmem>>, vector<32x64xbf16>
    %cst_97 = arith.constant dense<0.000000e+00> : vector<64x64xf32>
    %410 = tpu.matmul %408, %409, %cst_97 {dimension_numbers = #tpu.dot_dimension_numbers<[1], [0], [0], [1], [0, 0, 1, 1], [], []>} : vector<64x32xbf16>, vector<32x64xbf16>, vector<64x64xf32> -> vector<64x64xf32>
    %c0_98 = arith.constant 0 : index
    %c0_99 = arith.constant 0 : index
    %411 = vector.load %arg11[%c0_98, %c0_99] : memref<1x64xf32, #tpu.memory_space<vmem>>, vector<1x64xf32>
    %412 = vector.broadcast %411 : vector<1x64xf32> to vector<64x64xf32>
    %413 = arith.addf %410, %412 : vector<64x64xf32>
    %414 = vector.shape_cast %413 : vector<64x64xf32> to vector<8x8x64xf32>
    %415 = vector.extract_strided_slice %414 {offsets = [0, 0, 0], sizes = [8, 8, 32], strides = [1, 1, 1]} : vector<8x8x64xf32> to vector<8x8x32xf32>
    %416 = vector.extract_strided_slice %414 {offsets = [0, 0, 32], sizes = [8, 8, 32], strides = [1, 1, 1]} : vector<8x8x64xf32> to vector<8x8x32xf32>
    %417 = vector.shape_cast %407 : vector<8x32xf32> to vector<1x8x32xf32>
    %418 = vector.broadcast %417 : vector<1x8x32xf32> to vector<8x8x32xf32>
    %419 = arith.mulf %418, %415 : vector<8x8x32xf32>
    %420 = vector.shape_cast %419 : vector<8x8x32xf32> to vector<64x32xf32>
    %c0_100 = arith.constant 0 : index
    %c0_101 = arith.constant 0 : index
    %421 = vector.load %arg16[%c0_100, %c0_101] : memref<32x4xf32, #tpu.memory_space<vmem>>, vector<32x4xf32>
    %cst_102 = arith.constant dense<0.000000e+00> : vector<64x4xf32>
    %422 = tpu.matmul %420, %421, %cst_102 {dimension_numbers = #tpu.dot_dimension_numbers<[1], [0], [0], [1], [0, 0, 1, 1], [], []>} : vector<64x32xf32>, vector<32x4xf32>, vector<64x4xf32> -> vector<64x4xf32>
    %423 = vector.shape_cast %422 : vector<64x4xf32> to vector<8x8x4xf32>
    %cst_103 = arith.constant dense<0xFF800000> : vector<8x4xf32>
    %424 = vector.multi_reduction <maximumf>, %423, %cst_103 [0] : vector<8x8x4xf32> to vector<8x4xf32>
    %425 = vector.shape_cast %424 : vector<8x4xf32> to vector<1x8x4xf32>
    %426 = vector.broadcast %425 : vector<1x8x4xf32> to vector<8x8x4xf32>
    %427 = arith.subf %423, %426 : vector<8x8x4xf32>
    %428 = math.exp %427 : vector<8x8x4xf32>
    %cst_104 = arith.constant dense<0.000000e+00> : vector<8x4xf32>
    %429 = vector.multi_reduction <add>, %428, %cst_104 [0] : vector<8x8x4xf32> to vector<8x4xf32>
    %430 = vector.shape_cast %429 : vector<8x4xf32> to vector<1x8x4xf32>
    %431 = tpu.reciprocal %430 {approx = true} : vector<1x8x4xf32> -> vector<1x8x4xf32>
    %432 = vector.broadcast %431 : vector<1x8x4xf32> to vector<8x8x4xf32>
    %433 = arith.mulf %428, %432 : vector<8x8x4xf32>
    %434 = vector.shape_cast %433 : vector<8x8x4xf32> to vector<64x4xf32>
    %c0_105 = arith.constant 0 : index
    %c0_106 = arith.constant 0 : index
    %435 = vector.load %arg17[%c0_105, %c0_106] : memref<4x32xf32, #tpu.memory_space<vmem>>, vector<4x32xf32>
    %cst_107 = arith.constant dense<0.000000e+00> : vector<64x32xf32>
    %436 = tpu.matmul %434, %435, %cst_107 {dimension_numbers = #tpu.dot_dimension_numbers<[1], [0], [0], [1], [0, 0, 1, 1], [], []>} : vector<64x4xf32>, vector<4x32xf32>, vector<64x32xf32> -> vector<64x32xf32>
    %437 = vector.shape_cast %436 : vector<64x32xf32> to vector<8x8x32xf32>
    %438 = arith.mulf %437, %416 : vector<8x8x32xf32>
    %cst_108 = arith.constant dense<0.000000e+00> : vector<8x32xf32>
    %439 = vector.multi_reduction <add>, %438, %cst_108 [0] : vector<8x8x32xf32> to vector<8x32xf32>
    %440 = arith.truncf %439 : vector<8x32xf32> to vector<8x32xbf16>
    %c0_109 = arith.constant 0 : index
    %c0_110 = arith.constant 0 : index
    %441 = vector.load %arg12[%c0_109, %c0_110] : memref<32x32xbf16, #tpu.memory_space<vmem>>, vector<32x32xbf16>
    %cst_111 = arith.constant dense<0.000000e+00> : vector<8x32xf32>
    %442 = tpu.matmul %440, %441, %cst_111 {dimension_numbers = #tpu.dot_dimension_numbers<[1], [0], [0], [1], [0, 0, 1, 1], [], []>} : vector<8x32xbf16>, vector<32x32xbf16>, vector<8x32xf32> -> vector<8x32xf32>
    %c0_112 = arith.constant 0 : index
    %c0_113 = arith.constant 0 : index
    %443 = vector.load %arg13[%c0_112, %c0_113] : memref<1x32xf32, #tpu.memory_space<vmem>>, vector<1x32xf32>
    %444 = vector.broadcast %443 : vector<1x32xf32> to vector<8x32xf32>
    %445 = arith.addf %442, %444 : vector<8x32xf32>
    %446 = arith.truncf %445 : vector<8x32xf32> to vector<8x32xbf16>
    %c0_114 = arith.constant 0 : index
    %c0_115 = arith.constant 0 : index
    %447 = vector.load %arg14[%c0_114, %c0_115] : memref<32x4xbf16, #tpu.memory_space<vmem>>, vector<32x4xbf16>
    %cst_116 = arith.constant dense<0.000000e+00> : vector<8x4xf32>
    %448 = tpu.matmul %446, %447, %cst_116 {dimension_numbers = #tpu.dot_dimension_numbers<[1], [0], [0], [1], [0, 0, 1, 1], [], []>} : vector<8x32xbf16>, vector<32x4xbf16>, vector<8x4xf32> -> vector<8x4xf32>
    %c0_117 = arith.constant 0 : index
    %c0_118 = arith.constant 0 : index
    %449 = vector.load %arg15[%c0_117, %c0_118] : memref<1x4xf32, #tpu.memory_space<vmem>>, vector<1x4xf32>
    %450 = vector.broadcast %449 : vector<1x4xf32> to vector<8x4xf32>
    %451 = arith.addf %448, %450 : vector<8x4xf32>
    %c0_119 = arith.constant 0 : index
    %c0_120 = arith.constant 0 : index
    %452 = vector.load %arg18[%c0_119, %c0_120] : memref<8x4xf32, #tpu.memory_space<vmem>>, vector<8x4xf32>
    tpu.vector_store %arg18[%c0_119, %c0_120], %451 {strides = array<i32>} : memref<8x4xf32, #tpu.memory_space<vmem>>, vector<8x4xf32>,
    return
  }
  func.func @transform_0(%arg0: i32) -> (i32, i32, i32) {
    %c0_i32 = arith.constant 0 : i32
    %c0_i32_0 = arith.constant 0 : i32
    %c0_i32_1 = arith.constant 0 : i32
    return %c0_i32, %arg0, %c0_i32_0 : i32, i32, i32
  }
  func.func @transform_1(%arg0: i32) -> (i32, i32) {
    %c0_i32 = arith.constant 0 : i32
    %c0_i32_0 = arith.constant 0 : i32
    %c0_i32_1 = arith.constant 0 : i32
    return %c0_i32, %c0_i32_0 : i32, i32
  }
  func.func @transform_2(%arg0: i32) -> (i32, i32) {
    %c0_i32 = arith.constant 0 : i32
    %c0_i32_0 = arith.constant 0 : i32
    %c0_i32_1 = arith.constant 0 : i32
    return %c0_i32, %c0_i32_0 : i32, i32
  }
  func.func @transform_3(%arg0: i32) -> (i32, i32) {
    %c0_i32 = arith.constant 0 : i32
    %c0_i32_0 = arith.constant 0 : i32
    %c0_i32_1 = arith.constant 0 : i32
    return %c0_i32, %c0_i32_0 : i32, i32
  }
  func.func @transform_4(%arg0: i32) -> (i32, i32) {
    %c0_i32 = arith.constant 0 : i32
    %c0_i32_0 = arith.constant 0 : i32
    %c0_i32_1 = arith.constant 0 : i32
    return %c0_i32, %c0_i32_0 : i32, i32
  }
  func.func @transform_5(%arg0: i32) -> (i32, i32) {
    %c0_i32 = arith.constant 0 : i32
    %c0_i32_0 = arith.constant 0 : i32
    %c0_i32_1 = arith.constant 0 : i32
    return %c0_i32, %c0_i32_0 : i32, i32
  }
  func.func @transform_6(%arg0: i32) -> (i32, i32) {
    %c0_i32 = arith.constant 0 : i32
    %c0_i32_0 = arith.constant 0 : i32
    %c0_i32_1 = arith.constant 0 : i32
    return %c0_i32, %c0_i32_0 : i32, i32
  }
  func.func @transform_7(%arg0: i32) -> (i32, i32) {
    %c0_i32 = arith.constant 0 : i32
    %c0_i32_0 = arith.constant 0 : i32
    %c0_i32_1 = arith.constant 0 : i32
    return %c0_i32, %c0_i32_0 : i32, i32
  }
  func.func @transform_8(%arg0: i32) -> (i32, i32) {
    %c0_i32 = arith.constant 0 : i32
    %c0_i32_0 = arith.constant 0 : i32
    %c0_i32_1 = arith.constant 0 : i32
    return %c0_i32, %c0_i32_0 : i32, i32
  }
  func.func @transform_9(%arg0: i32) -> (i32, i32) {
    %c0_i32 = arith.constant 0 : i32
    %c0_i32_0 = arith.constant 0 : i32
    %c0_i32_1 = arith.constant 0 : i32
    return %c0_i32, %c0_i32_0 : i32, i32
  }
  func.func @transform_10(%arg0: i32) -> (i32, i32) {
    %c0_i32 = arith.constant 0 : i32
    %c0_i32_0 = arith.constant 0 : i32
    %c0_i32_1 = arith.constant 0 : i32
    return %c0_i32, %c0_i32_0 : i32, i32
  }
  func.func @transform_11(%arg0: i32) -> (i32, i32) {
    %c0_i32 = arith.constant 0 : i32
    %c0_i32_0 = arith.constant 0 : i32
    %c0_i32_1 = arith.constant 0 : i32
    return %c0_i32, %c0_i32_0 : i32, i32
  }
  func.func @transform_12(%arg0: i32) -> (i32, i32) {
    %c0_i32 = arith.constant 0 : i32
    %c0_i32_0 = arith.constant 0 : i32
    %c0_i32_1 = arith.constant 0 : i32
    return %c0_i32, %c0_i32_0 : i32, i32
  }
  func.func @transform_13(%arg0: i32) -> (i32, i32) {
    %c0_i32 = arith.constant 0 : i32
    %c0_i32_0 = arith.constant 0 : i32
    %c0_i32_1 = arith.constant 0 : i32
    return %c0_i32, %c0_i32_0 : i32, i32
  }
  func.func @transform_14(%arg0: i32) -> (i32, i32) {
    %c0_i32 = arith.constant 0 : i32
    %c0_i32_0 = arith.constant 0 : i32
    %c0_i32_1 = arith.constant 0 : i32
    return %c0_i32, %c0_i32_0 : i32, i32
  }
  func.func @transform_15(%arg0: i32) -> (i32, i32) {
    %c0_i32 = arith.constant 0 : i32
    %c0_i32_0 = arith.constant 0 : i32
    %c0_i32_1 = arith.constant 0 : i32
    return %c0_i32, %c0_i32_0 : i32, i32
  }
  func.func @transform_16(%arg0: i32) -> (i32, i32) {
    %c0_i32 = arith.constant 0 : i32
    %c0_i32_0 = arith.constant 0 : i32
    %c0_i32_1 = arith.constant 0 : i32
    return %c0_i32, %c0_i32_0 : i32, i32
  }
  func.func @transform_17(%arg0: i32) -> (i32, i32) {
    %c0_i32 = arith.constant 0 : i32
    %c0_i32_0 = arith.constant 0 : i32
    return %arg0, %c0_i32 : i32, i32
  }
}

</mosaic_0001>

<bundles_post_ra>
// kernel: tpu_custom_call.1
= control target key start
LH: loop header
LB: loop body
LE: loop exit
PB: predicated region body
PF: predicated region fallthrough
CT: control target
= control target key end

     0   :  { %s4983_s0 = inlined_call_operand.hbm [shape: f32[8,16,16], index: 0, kind: input, shape index: {}]   ;;  %s4984_s1 = inlined_call_operand.hbm [shape: bf16[16,128], index: 1, kind: input, shape index: {}]   ;;  %s4985_s2 = inlined_call_operand.vmem [shape: bf16[32,128], index: 2, kind: input, shape index: {}]   ;;  %s4986_s3 = inlined_call_operand.hbm [shape: f32[1,128], index: 3, kind: input, shape index: {}]   ;;  %s4987_s4 = inlined_call_operand.vmem [shape: bf16[32,128], index: 4, kind: input, shape index: {}]   ;;  %s4988_s5 = inlined_call_operand.vmem [shape: bf16[32,128], index: 5, kind: input, shape index: {}]   ;;  %s4989_s6 = inlined_call_operand.hbm [shape: f32[1,128], index: 6, kind: input, shape index: {}]   ;;  %s4990_s7 = inlined_call_operand.vmem [shape: bf16[32,32], index: 7, kind: input, shape index: {}]   ;;  %s4991_s8 = inlined_call_operand.hbm [shape: f32[1,32], index: 8, kind: input, shape index: {}]   ;;  %s4992_s9 = inlined_call_operand.vmem [shape: bf16[32,64], index: 9, kind: input, shape index: {}]   ;;  %s4993_s10 = inlined_call_operand.vmem [shape: f32[1,64], index: 10, kind: input, shape index: {}]   ;;  %s4994_s11 = inlined_call_operand.hbm [shape: bf16[32,32], index: 11, kind: input, shape index: {}]   ;;  %s4995_s12 = inlined_call_operand.vmem [shape: f32[1,32], index: 12, kind: input, shape index: {}]   ;;  %s4996_s13 = inlined_call_operand.vmem [shape: bf16[32,4], index: 13, kind: input, shape index: {}]   ;;  %s4997_s14 = inlined_call_operand.vmem [shape: f32[1,4], index: 14, kind: input, shape index: {}]   ;;  %s4998_s15 = inlined_call_operand.vmem [shape: f32[32,4], index: 15, kind: input, shape index: {}]   ;;  %s4999_s16 = inlined_call_operand.vmem [shape: f32[4,32], index: 16, kind: input, shape index: {}]   ;;  %s5000_s17 = inlined_call_operand.vmem [shape: f32[16,4], index: 17, kind: output, shape index: {}]  }
   0x1   :  { %5010 = sst [smem:[#allocation16_spill]] %s4983_s0 }
   0x2   :  { %5011 = sst [smem:[#allocation17_spill]] %s4984_s1 }
   0x3   :  { %5012 = sst [smem:[#allocation18_spill]] %s4992_s9 }
   0x4   :  { %5013 = sst [smem:[#allocation19_spill]] %s4993_s10 }
   0x5   :  { %5014 = sst [smem:[#allocation20_spill]] %s4995_s12 }
   0x6   :  { %5015 = sst [smem:[#allocation21_spill]] %s4996_s13 }
   0x7   :  { %5016 = sst [smem:[#allocation22_spill]] %s4997_s14 }
   0x8   :  { %5017 = sst [smem:[#allocation23_spill]] %s4998_s15 }
   0x9   :  { %5018 = sst [smem:[#allocation24_spill]] %s4999_s16 }
   0xa   :  { %5019 = sst [smem:[#allocation25_spill]] %s5000_s17 }
   0xb   :  { %22 = vsyncpa [#allocation3], 0 }
   0xc   :  { %24 = vsyncpa [#allocation3 + $0x1], 0 }
   0xd   :  { %25 = vsyncpa [#allocation5], 0 }
   0xe   :  { %26 = vsyncpa [#allocation8], 0 }
   0xf   :  { %27 = vsyncpa [#allocation11], 0  ;;  %s4221_s24 = smov 0   ;;  %s4223_s25 = smov 0  }
  0x10   :  { %s4225_s26 = smov 0   ;;  %s4227_s27 = smov 0  }
  0x11 LB: > { %s4240_s28 = sadd.s32 4294967295, %s4112_s27   ;;  %p53_p0 = scmp.ne.s32.totalorder %s4104_s25, %s4100_s24  ;;  %s4112_s27 = sphi %s4227_s27, %s5047_s27   ;;  %s4108_s26 = sphi %s4225_s26, %s5046_s26   ;;  %s4104_s25 = sphi %s4223_s25, %s5045_s25   ;;  %s4100_s24 = sphi %s4221_s24, %s5044_s24  }
  0x12   : > { %p5004_p1 = scmp.eq.s32.totalorder %s4240_s28, 0  ;;  %p3108_p2 = scmp.ge.s32.totalorder %s4112_s27, 1 }
  0x13   : > { %p426_p3 = scmp.lt.s32.totalorder %s4112_s27, 3  ;;  %s4114_s30 = smov [#allocation4]  }
  0x14   : > { %p4248_p4 = por %p5004_p1, %p53_p0  ;;  %s438_s18 = sshll.u32 %s4114_s30, 4  ;;  %s4256_s18 = int_to_ptr.vmem [resolvable:$true] %s438_s18 }
  0x15   : > { %p4252_p5 = pnand %p3108_p2, %p426_p3  ;;  %s4115_s1 = smov [#allocation7]  }
  0x16   : > { %s5020_s29 = scalar_select %p4248_p4, 1, 0 }
  0x17   : > { %s5021_s0 = scalar_select %p4252_p5, 1, 0 }
  0x18   : > { %p3685_p6 = pneg %p4252_p5  ;;  %s472_s20 = sshll.u32 %s4115_s1, 4  ;;  %s4266_s20 = int_to_ptr.vmem [resolvable:$true] %s472_s20 }
  0x19   : > { %s4116_s21 = smov [#allocation6]   ;;  %s5023_s30 = sld [smem:[#allocation17_spill]] }
  0x1a   : > { %p4262_p7 = pnand %p3685_p6, %p5004_p1  ;;  %s4268_s22 = sshll.u32 %s4116_s21, 4  ;;  %s456_s22 = int_to_ptr.vmem [resolvable:$true] %s4268_s22 }
  0x1c   : > { %p4278_p9 = pneg %p4262_p7 }
  0x1f   : > { %s3896_s17 = scalar_lea.hbm %s5023_s30, 128 }
  0x20   : > { %p3897_p8 = scmp.ne.s32.totalorder %s5023_s30, %s3896_s17  ;;  %p3903_p12 = scmp.lt.u32.totalorder %s3896_s17, %s5023_s30 }
  0x22   : > { %p3899_p10 = pnand %p4278_p9, %p3897_p8 }
  0x24   : > { %p3900_p11 = pneg %p3899_p10 }
  0x26   : > { %p3905_p13 = pnand %p3903_p12, %p3900_p11 }
  0x28   : > { %3908 = shalt.err (!%p3905_p13)
}
  0x29   : > { %s3909_s12 = scalar_lea.vmem %s4256_s18, 128  ;;  %p3917_p6 = scmp.lt.s32.totalorder %s4256_s18, %s4256_s18 }
  0x2a   : > { %p3910_p0 = scmp.ne.s32.totalorder %s4256_s18, %s3909_s12  ;;  %p3918_p1 = scmp.lt.s32.totalorder %s3909_s12, %s3909_s12 }
  0x2c   : > { %p3912_p2 = pnand %p3910_p0, %p4278_p9  ;;  %p3919_p8 = por %p3918_p1, %p3917_p6 }
  0x2e   : > { %p3913_p3 = pneg %p3912_p2 }
  0x30   : > { %p3920_p10 = pnand %p3919_p8, %p3913_p3 }
  0x32   : > { %3923 = shalt.err (!%p3920_p10)
}
  0x33   : > { %s5009_s14 = smov 64   ;;  %s4118_s17 = smov 4  }
  0x34   : > { %3688 = dma.hbm_to_vmem [thread:$0]  (!%p4262_p7), %s5023_s30, 128, %s4256_s18, [#allocation5], %s5009_s14, %s5009_s14, %s4118_s17  }
  0x35   : > { %s3924_s12 = scalar_lea.hbm %s4989_s6, 16 }
  0x36   : > { %p3925_p1 = scmp.ne.s32.totalorder %s4989_s6, %s3924_s12  ;;  %p3931_p13 = scmp.lt.u32.totalorder %s3924_s12, %s4989_s6 }
  0x38   : > { %p3927_p11 = pnand %p3925_p1, %p4278_p9 }
  0x3a   : > { %p3928_p12 = pneg %p3927_p11 }
  0x3c   : > { %p3933_p0 = pnand %p3931_p13, %p3928_p12 }
  0x3e   : > { %3936 = shalt.err (!%p3933_p0)
}
  0x3f   : > { %s3937_s18 = scalar_lea.vmem %s4266_s20, 16  ;;  %s3944_s10 = scalar_lea.vmem %s4266_s20, 32 }
  0x40   : > { %p3938_p2 = scmp.ne.s32.totalorder %s4266_s20, %s3937_s18  ;;  %p3945_p8 = scmp.lt.s32.totalorder %s4266_s20, %s4266_s20 }
  0x41   : > { %p3946_p10 = scmp.lt.s32.totalorder %s3944_s10, %s3937_s18 }
  0x42   : > { %p3940_p3 = pnand %p3938_p2, %p4278_p9 }
  0x43   : > { %p3947_p1 = por %p3946_p10, %p3945_p8 }
  0x44   : > { %p3941_p6 = pneg %p3940_p3 }
  0x46   : > { %p3948_p11 = pnand %p3947_p1, %p3941_p6 }
  0x48   : > { %3951 = shalt.err (!%p3948_p11)
}
  0x49   : > { %3694 = dma.hbm_to_vmem [thread:$0]  (!%p4262_p7), %s4989_s6, 16, %s4266_s20, [#allocation8]  }
  0x4a   : > { %s3952_s24 = scalar_lea.hbm %s4986_s3, 16 }
  0x4b   : > { %p3953_p12 = scmp.ne.s32.totalorder %s4986_s3, %s3952_s24  ;;  %p3959_p2 = scmp.lt.u32.totalorder %s3952_s24, %s4986_s3 }
  0x4d   : > { %p3955_p13 = pnand %p3953_p12, %p4278_p9 }
  0x4f   : > { %p3956_p0 = pneg %p3955_p13 }
  0x51   : > { %p3961_p3 = pnand %p3959_p2, %p3956_p0 }
  0x53   : > { %3964 = shalt.err (!%p3961_p3)
}
  0x54   : > { %s3965_s10 = scalar_lea.vmem %s456_s22, 16  ;;  %s3972_s20 = scalar_lea.vmem %s456_s22, 32 }
  0x55   : > { %p3966_p6 = scmp.ne.s32.totalorder %s456_s22, %s3965_s10  ;;  %p3973_p1 = scmp.lt.s32.totalorder %s456_s22, %s456_s22 }
  0x56   : > { %p3974_p11 = scmp.lt.s32.totalorder %s3972_s20, %s3965_s10 }
  0x57   : > { %p3968_p8 = pnand %p3966_p6, %p4278_p9 }
  0x58   : > { %p3975_p4 = por %p3974_p11, %p3973_p1 }
  0x59   : > { %p3969_p10 = pneg %p3968_p8 }
  0x5b   : > { %p3976_p5 = pnand %p3975_p4, %p3969_p10 }
  0x5d   : > { %3979 = shalt.err (!%p3976_p5)
}
  0x5e   : > { %3691 = dma.hbm_to_vmem [thread:$0]  (!%p4262_p7), %s4986_s3, 16, %s456_s22, [#allocation5]  }
  0x5f   : > { %s4119_s16 = smov [#allocation9]   ;;  %s4120_s24 = smov [#allocation10]  }
  0x60   : > { %s486_s23 = sshll.u32 %s4119_s16, 4  ;;  %s502_s1 = sshll.u32 %s4120_s24, 4  ;;  %s487_s23 = int_to_ptr.vmem [resolvable:$true] %s486_s23  ;;  %s503_s1 = int_to_ptr.vmem [resolvable:$true] %s502_s1 }
  0x61   : > { %s3980_s18 = scalar_lea.hbm %s4991_s8, 16 }
  0x62   : > { %p3981_p4 = scmp.ne.s32.totalorder %s4991_s8, %s3980_s18  ;;  %p3987_p13 = scmp.lt.u32.totalorder %s3980_s18, %s4991_s8 }
  0x64   : > { %p3983_p5 = pnand %p3981_p4, %p4278_p9 }
  0x66   : > { %p3984_p12 = pneg %p3983_p5 }
  0x68   : > { %p3989_p0 = pnand %p3987_p13, %p3984_p12 }
  0x6a   : > { %3992 = shalt.err (!%p3989_p0)
}
  0x6b   : > { %s3993_s22 = scalar_lea.vmem %s487_s23, 16  ;;  %s4000_s15 = scalar_lea.vmem %s487_s23, 32 }
  0x6c   : > { %p3994_p2 = scmp.ne.s32.totalorder %s487_s23, %s3993_s22  ;;  %p4001_p8 = scmp.lt.s32.totalorder %s487_s23, %s487_s23 }
  0x6d   : > { %p4002_p10 = scmp.lt.s32.totalorder %s4000_s15, %s3993_s22 }
  0x6e   : > { %p3996_p3 = pnand %p3994_p2, %p4278_p9 }
  0x6f   : > { %p4003_p1 = por %p4002_p10, %p4001_p8 }
  0x70   : > { %p3997_p6 = pneg %p3996_p3 }
  0x72   : > { %p4004_p11 = pnand %p4003_p1, %p3997_p6 }
  0x74   : > { %4007 = shalt.err (!%p4004_p11)
}
  0x75   : > { %3697 = dma.hbm_to_vmem [thread:$0]  (!%p4262_p7), %s4991_s8, 16, %s487_s23, [#allocation8]  }
  0x76   : > { %s4008_s12 = scalar_lea.hbm %s4994_s11, 256 }
  0x77   : > { %p4009_p4 = scmp.ne.s32.totalorder %s4994_s11, %s4008_s12  ;;  %p4015_p13 = scmp.lt.u32.totalorder %s4008_s12, %s4994_s11 }
  0x79   : > { %p4011_p5 = pnand %p4009_p4, %p4278_p9 }
  0x7b   : > { %p4012_p12 = pneg %p4011_p5 }
  0x7d   : > { %p4017_p0 = pnand %p4015_p13, %p4012_p12 }
  0x7f   : > { %4020 = shalt.err (!%p4017_p0)
}
  0x80   : > { %s4021_s22 = scalar_lea.vmem %s503_s1, 256  ;;  %p4029_p8 = scmp.lt.s32.totalorder %s503_s1, %s503_s1 }
  0x81   : > { %p4022_p2 = scmp.ne.s32.totalorder %s503_s1, %s4021_s22  ;;  %p4030_p10 = scmp.lt.s32.totalorder %s4021_s22, %s4021_s22 }
  0x83   : > { %p4024_p3 = pnand %p4022_p2, %p4278_p9  ;;  %p4031_p1 = por %p4030_p10, %p4029_p8 }
  0x85   : > { %p4025_p6 = pneg %p4024_p3 }
  0x87   : > { %p4032_p11 = pnand %p4031_p1, %p4025_p6 }
  0x89   : > { %4035 = shalt.err (!%p4032_p11)
}
  0x8a   : > { %s5025_s23 = smov 64   ;;  %s4385_s13 = sadd.s32 1, %s4112_s27  }
  0x8b   : > { %3700 = dma.hbm_to_vmem [thread:$0]  (!%p4262_p7), %s4994_s11, 256, %s503_s1, [#allocation11], %s5025_s23, %s5025_s23, %s4118_s17  }
  0x8c   : > { %s37_s19 = ssub.s32 %s4112_s27, %s4385_s13  ;;  %s40_s24 = sadd.s32 1, %s4108_s26 }
  0x8d   : > { %p38_p9 = scmp.eq.s32.totalorder %s37_s19, 0  ;;  %p47_p4 = scmp.ne.s32.totalorder %s4108_s26, %s4104_s25 }
  0x8e   : > { %p48_p5 = scmp.eq.s32.totalorder %s4112_s27, 0  ;;  %p3710_p12 = scmp.lt.s32.totalorder %s4112_s27, 2 }
  0x8f   : > { %s4395_s14 = scalar_select %p38_p9, %s4108_s26, %s40_s24  }
  0x90   : > { %p49_p13 = por %p48_p5, %p47_p4  ;;  %s531_s21 = sand.u32 1, %s4108_s26  }
  0x91   : > { %s3115_s12 = sshll.u32 %s531_s21, 6  ;;  %s3116_s18 = sshll.u32 %s4112_s27, 7 }
  0x92   : > { %s5026_s9 = sld [smem:[#allocation16_spill]]  ;;  %s535_s17 = scalar_lea.vmem [#allocation2], %s3115_s12 }
  0x93   : > { %s541_s1 = sshll.u32 %s535_s17, 4  ;;  %p4406_p7 = pnand %p3710_p12, %p49_p13  ;;  %s4404_s1 = int_to_ptr.vmem [resolvable:$true] %s541_s1 }
  0x94   : > { %s4410_s27 = scalar_lea.sflag [#allocation3], %s531_s21 }
  0x95   : > { %p4038_p2 = pneg %p4406_p7 }
  0x98   : > { %s4402_s22 = scalar_lea.hbm %s5026_s9, %s3116_s18  ;;  %s4041_s24 = scalar_lea.hbm %s5026_s9, 2048 }
  0x99   : > { %s4036_s15 = scalar_lea.hbm %s4402_s22, 1024  ;;  %p4042_p8 = scmp.lt.u32.totalorder %s4402_s22, %s5026_s9 }
  0x9a   : > { %p4037_p0 = scmp.ne.s32.totalorder %s4402_s22, %s4036_s15  ;;  %p4043_p10 = scmp.lt.u32.totalorder %s4041_s24, %s4036_s15 }
  0x9b   : > { %p4045_p11 = scmp.lt.u32.totalorder %s4036_s15, %s4402_s22 }
  0x9c   : > { %p4039_p3 = pnand %p4038_p2, %p4037_p0  ;;  %p4044_p1 = por %p4043_p10, %p4042_p8 }
  0x9e   : > { %p4040_p6 = pneg %p4039_p3  ;;  %p4046_p9 = por %p4045_p11, %p4044_p1 }
  0xa0   : > { %p4047_p4 = pnand %p4046_p9, %p4040_p6 }
  0xa2   : > { %4050 = shalt.err (!%p4047_p4)
}
  0xa3   : > { %s4051_s21 = scalar_lea.vmem %s4404_s1, 1024  ;;  %s4121_s10 = smov [#allocation2]  }
  0xa4   : > { %p4052_p5 = scmp.ne.s32.totalorder %s4404_s1, %s4051_s21  ;;  %s4056_s20 = sshll.u32 %s4121_s10, 4  ;;  %s4057_s20 = int_to_ptr.vmem [resolvable:$false] %s4056_s20 }
  0xa5   : > { %s4058_s17 = scalar_lea.vmem %s4057_s20, 2048  ;;  %p4059_p0 = scmp.lt.s32.totalorder %s4404_s1, %s4057_s20 }
  0xa6   : > { %p4054_p12 = pnand %p4052_p5, %p4038_p2  ;;  %p4060_p3 = scmp.lt.s32.totalorder %s4058_s17, %s4051_s21 }
  0xa8   : > { %p4055_p13 = pneg %p4054_p12  ;;  %p4061_p8 = por %p4060_p3, %p4059_p0 }
  0xaa   : > { %p4062_p10 = pnand %p4061_p8, %p4055_p13 }
  0xac   : > { %4065 = shalt.err (!%p4062_p10)
}
  0xad   : > { %s4122_s15 = smov 256   ;;  %s4123_s16 = smov 128  }
  0xae   : > { %s4124_s19 = smov 8   ;;  %p5028_p2 = scmp.ne.s32.totalorder %s5021_s0, 0 }
  0xaf   : > { %3704 = dma.hbm_to_vmem [thread:$0]  (!%p4406_p7), %s4402_s22, 1024, %s4404_s1, %s4410_s27, %s4122_s15, %s4123_s16, %s4124_s19  }
  0xb0   : > { %553 = sbr.rel (%p5028_p2) target bundleno = 7890 (0x1ed2), region = 88  ;;  %s555_s24 = sand.u32 (!%p5028_p2), 1, %s4104_s25  }
  0xb1   : > { %s3118_s12 = sshll.u32 (!%p5028_p2), %s555_s24, 6  ;;  %s556_s18 = scalar_lea.sflag (!%p5028_p2), [#allocation3], %s555_s24 }
  0xb2   : > { %s4441_s21 = scalar_lea.vmem (!%p5028_p2), [#allocation2], %s3118_s12  ;;  %p5029_p6 = scmp.ne.s32.totalorder (!%p5028_p2), %s5020_s29, 0 }
  0xb7   : > { %4083 = dma.done.wait (%p5029_p6), %s556_s18, 1024  }
  0xb8   : > { %4085 = vsyncadd (%p5029_p6), %s556_s18, 4294966272  ;;  %p5030_p1 = scmp.eq.s32.totalorder %s4240_s28, 0 }
  0xba   : > { %4087 = dma.done.wait (%p5030_p1), [#allocation5], 144   ;;  %p5031_p7 = pmov %p5030_p1 }
  0xbb   : > { %p5032_p11 = pmov %p5030_p1 }
  0xbc   : > { %4089 = vsyncadd (%p5031_p7), [#allocation5], 4294967152 }
  0xbd   : > { %4091 = dma.done.wait (%p5032_p11), [#allocation8], 32   ;;  %p5033_p9 = pmov %p5030_p1 }
  0xbe   : > { %p5034_p4 = pmov %p5030_p1 }
  0xbf   : > { %4093 = vsyncadd (%p5033_p9), [#allocation8], 4294967264 }
  0xc0   : > { %4095 = dma.done.wait (%p5034_p4), [#allocation11], 256   ;;  %p5035_p5 = pmov %p5030_p1 }
  0xc1   : > { %v4125_v0 = vmov 0.0   ;;  %vm4126_vm0 = vmmov 0   ;;  %v3764_v1 = vld [vmem:[#allocation4] sm:$0xff]   ;;  %v648_v4 = vld [vmem:[%s4441_s21 + $0x8] sm:$0xff]  ;;  %vm674_vm1 = vcmask 130048   ;;  %v649_v5 = vld [vmem:[%s4441_s21 + $0x10] sm:$0xff] }
  0xc2   : > { %4097 = vsyncadd (%p5035_p5), [#allocation11], 4294967040  ;;  %3353 = vmatprep.subr.bf16.mxu1 %v4125_v0  ;;  %3357 = vmatprep.mubr.msk.bf16.mxu1 %vm4126_vm0, %v4125_v0  ;;  %v4465_v2 = vld [vmem:[%s4985_s2] sm:$0xff]   ;;  %v650_v7 = vld [vmem:[%s4441_s21 + $0x18] sm:$0xff]  ;;  %v4127_v10 = vmov 0   ;;  %s4128_s23 = smov 64  }
  0xc3   : > { %3343 = vmatprep.subr.bf16.mxu0 %v3764_v1  ;;  %v647_v3 = vld [vmem:[%s4441_s21] sm:$0xff]  ;;  %3354 = vmatpush3.bf16.msra.mxu1 %v4465_v2  ;;  %v656_v8 = vpack.c.bf16 %v650_v7, %v649_v5  ;;  %v4476_v9 = vld [vmem:[%s4985_s2 + $0x8] sm:$0xff]   ;;  %s4129_s27 = smov 32   ;;  %v653_v35 = vld [vmem:[%s4441_s21 + $0x30] sm:$0xff]  ;;  %vm764_vm2 = vcmask 261120   ;;  %s5036_s16 = sld [smem:[#allocation18_spill]] }
  0xc4   : > { %3344 = vmatpush3.bf16.msra.mxu0 %v3764_v1  ;;  %v655_v6 = vpack.c.bf16 %v648_v4, %v647_v3  ;;  %3355 = vmatprep.subr.bf16.mxu1 %v4125_v0  ;;  %v4490_v11 = vld [vmem:[#allocation6] ss:$0 sm:$0xff]  ;;  %v651_v33 = vld [vmem:[%s4441_s21 + $0x20] sm:$0xff]  ;;  %v654_v37 = vld [vmem:[%s4441_s21 + $0x38] sm:$0xff]  ;;  %s5037_s12 = sld [smem:[#allocation23_spill]]  ;;  %s5038_s17 = sld [smem:[#allocation19_spill]] }
  0xc5   : > { %3377 = vmatprep.subr.bf16.mxu0 %v4125_v0  ;;  %v652_v34 = vld [vmem:[%s4441_s21 + $0x28] sm:$0xff]  ;;  %v4511_v38 = vld [vmem:[%s4987_s4] sm:$0xff]   ;;  %v658_v39 = vpack.c.bf16 %v654_v37, %v653_v35  ;;  %s4130_s15 = smov 96   ;;  %vm2695_vm3 = vcmask 1043456   ;;  %vm2606_vm4 = vcmask 31744   ;;  %s5040_s21 = sld [smem:[#allocation21_spill]] }
  0xc6   : > { %3345 = vmatprep.mubr.msk.bf16.mxu0 %vm674_vm1, %v655_v6  ;;  %v657_v36 = vpack.c.bf16 %v652_v34, %v651_v33  ;;  %v4518_v40 = vld [vmem:[%s4987_s4 + $0x8] sm:$0xff]   ;;  %v4539_v49 = vld [vmem:[%s4988_s5] sm:$0xff]   ;;  %s5041_s10 = sld [smem:[#allocation20_spill]]  ;;  %p629_p12 = scmp.lt.s32.totalorder %s4240_s28, 1 }
  0xc7   : > { %3346 = vmatmul.mubr.msk.bf16.vlgmr.msra.gmra.mrb[0].mxu0 %vm674_vm1, %v656_v8  ;;  %3356 = vmatpush3.bf16.msra.mxu1 %v4476_v9  ;;  %v4547_v51 = vld [vmem:[%s4988_s5 + $0x8] sm:$0xff]   ;;  %s5043_s24 = sld [smem:[#allocation25_spill]] }
  0xc8   : > { %3378 = vmatpush3.bf16.msra.mxu0 %v4465_v2  ;;  %3361 = vmatprep.subr.bf16.mxu1 %v4125_v0  ;;  %v4569_v59 = vld [vmem:[#allocation7] ss:$0 sm:$0xff]  ;;  %s5049_s28 = smov (!%p629_p12, %s4240_s28), 1 }
  0xc9   : > { %3379 = vmatprep.subr.bf16.mxu0 %v4125_v0  ;;  %3349 = vmatprep.mubr.msk.bf16.mxu0 %vm674_vm1, %v657_v36  ;;  %s3124_s20 = sshll.u32 %s5049_s28, 3 }
  0xca   : > { %3358 = vmatmul.mubr.bf16.vlgmr.msra.gmra.mrb[0].mxu1 %v4127_v10 }
  0xcb   : > { %3365 = vmatprep.mubr.msk.bf16.mxu1 %vm4126_vm0, %v4125_v0  ;;  %3362 = vmatpush3.bf16.msra.mxu1 %v4511_v38 }
  0xcc   : > { %3380 = vmatpush3.bf16.msra.mxu0 %v4476_v9  ;;  %3363 = vmatprep.subr.bf16.mxu1 %v4125_v0 }
  0xcd   : > { %3385 = vmatprep.subr.bf16.mxu0 %v4125_v0  ;;  %s632_s18 = scalar_lea.vmem %s5043_s24, %s3124_s20 }
  0xcf   : > { %3350 = vmatmul.mubr.msk.bf16.gmra.mrb[4].mxu0 %vm674_vm1, %v658_v39  ;;  %3364 = vmatpush3.bf16.msra.mxu1 %v4518_v40 }
  0xd0   : > { %3381 = vmatprep.mubr.msk.bf16.mxu0 %vm4126_vm0, %v4125_v0  ;;  %3369 = vmatprep.subr.bf16.mxu1 %v4125_v0 }
 0x19a   : > { %v4492_v12 = vpop.f32.mrb[0].mxu0 }
 0x19b   : > { %v721_v13 = vpop.f32.mrb[1].mxu0  ;;  %v730_v39 = vadd.f32 %v4492_v12, %v4490_v11 }
 0x19c   : > { %v722_v14 = vadd.f32 %v4490_v11, %v721_v13  ;;  %v4495_v15 = vpop.f32.mrb[2].mxu0 }
 0x19d   : > { %v4497_v16 = vpop.f32.mrb[3].mxu0  ;;  %v802_v17 = vpop.f32.mrb[0].mxu1 }
 0x19e   : > { %v808_v18 = vadd.f32 %v802_v17, %v722_v14  ;;  %v3359_v19 = vpop.f32.mrb[1].mxu1  ;;  %v725_v52 = vadd.f32 %v4490_v11, %v4497_v16 }
 0x19f   : > { %v805_v20 = vpop.f32.mrb[2].mxu1 }
 0x1a0   : > { %v3133_v21 = vmul.f32 -1.442695, %v808_v18  ;;  %v3360_v22 = vpop.f32.mrb[3].mxu1 }
 0x1a2   : > { %3779 = vpow2.f32 %v3133_v21  ;;  %v4528_v45 = vpop.f32.mrb[4].mxu0 }
 0x1a3   : > { %v4530_v46 = vpop.f32.mrb[5].mxu0 }
 0x1a4   : > { %v4532_v47 = vpop.f32.mrb[6].mxu0 }
 0x1a5   : > { %v4534_v48 = vpop.f32.mrb[7].mxu0 }
 0x1ac   : > { %v3780_v23 = vpop.eup %3779 }
 0x1ad   : > { %v812_v24 = vadd.f32 1.0, %v3780_v23 }
 0x1af   : > { %3781 = vrcp.f32 %v812_v24 }
 0x1b9   : > { %v3782_v25 = vpop.eup %3781 }
 0x1ba   : > { %v815_v26 = vmul.f32 2.0, %v3782_v25  ;;  %v817_v30 = vmul.f32 0.0, %v3782_v25 }
 0x1bc   : > { %v3134_v27 = vadd.f32 -1.0, %v815_v26 }
 0x1be   : > { %819 = vrot.lane.b32.xlu0 %v3134_v27, %s4128_s23 }
 0x230   : > { %v820_v28 = vpop.permute.xlu0 %819 }
 0x231   : > { %v822_v29 = vmul.f32 %v3782_v25, %v820_v28 }
 0x233   : > { %824 = vrot.lane.b32.xlu0 %v822_v29, %s4129_s27 }
 0x2a5   : > { %v825_v31 = vpop.permute.xlu0 %824 }
 0x2a6   : > { %v4501_v32 = vadd.f32 %v825_v31, %v817_v30 }
 0x2a8   : > { %3783 = vtanh.f32 %v4501_v32 }
 0x2b2   : > { %v3784_v41 = vpop.eup %3783 }
 0x2b3   : > { %830 = vrot.lane.b32.xlu1 %v3784_v41, %s4128_s23 }
 0x325   : > { %v831_v42 = vpop.permute.xlu1 %830 }
 0x326   : > { %v833_v43 = vmul.f32 %v3782_v25, %v831_v42 }
 0x328   : > { %v834_v44 = vpack.c.bf16 %v833_v43, %v833_v43 }
 0x32a   : > { %842 = vrot.lane.b32.xlu1 %v834_v44, %s4129_s27 }
 0x39c   : > { %v843_v50 = vpop.permute.xlu1 %842 }
 0x39d   : > { %3366 = vmatmul.mubr.msk.bf16.vlgmr.msra.gmra.mrb[4].mxu1 %vm764_vm2, %v843_v50  ;;  %3382 = vmatmul.mubr.msk.bf16.vlgmr.msra.gmra.mrb[8].mxu0 %vm764_vm2, %v843_v50 }
 0x39e   : > { %3370 = vmatpush3.bf16.msra.mxu1 %v4539_v49  ;;  %3373 = vmatprep.mubr.msk.bf16.mxu1 %vm4126_vm0, %v4125_v0 }
 0x39f   : > { %3371 = vmatprep.subr.bf16.mxu1 %v4125_v0  ;;  %3386 = vmatpush3.bf16.msra.mxu0 %v4511_v38 }
 0x3a0   : > { %3387 = vmatprep.subr.bf16.mxu0 %v4125_v0  ;;  %3389 = vmatprep.mubr.msk.bf16.mxu0 %vm4126_vm0, %v4125_v0 }
 0x3a2   : > { %3372 = vmatpush3.bf16.msra.mxu1 %v4547_v51 }
 0x3a3   : > { %3401 = vmatprep.subr.bf16.mxu1 %v4125_v0  ;;  %3388 = vmatpush3.bf16.msra.mxu0 %v4518_v40 }
 0x3a4   : > { %3393 = vmatprep.subr.bf16.mxu0 %v4125_v0 }
 0x3a9   : > { %3374 = vmatmul.mubr.bf16.vlgmr.msra.gmra.mrb[4].mxu1 %v4127_v10 }
 0x3aa   : > { %3402 = vmatpush3.bf16.msra.mxu1 %v4465_v2  ;;  %3405 = vmatprep.mubr.msk.bf16.mxu1 %vm4126_vm0, %v4125_v0 }
 0x3ab   : > { %3403 = vmatprep.subr.bf16.mxu1 %v4125_v0 }
 0x3ae   : > { %3404 = vmatpush3.bf16.msra.mxu1 %v4476_v9 }
 0x3af   : > { %3409 = vmatprep.subr.bf16.mxu1 %v4125_v0 }
 0x470   : > { %v1011_v53 = vpop.f32.mrb[8].mxu0 }
 0x471   : > { %v1017_v54 = vadd.f32 %v1011_v53, %v725_v52  ;;  %v3383_v55 = vpop.f32.mrb[9].mxu0 }
 0x472   : > { %v1014_v56 = vpop.f32.mrb[10].mxu0 }
 0x473   : > { %v3144_v57 = vmul.f32 -1.442695, %v1017_v54  ;;  %v3384_v58 = vpop.f32.mrb[11].mxu0 }
 0x475   : > { %3785 = vpow2.f32 %v3144_v57 }
 0x47c   : > { %v945_v60 = vpop.f32.mrb[4].mxu1 }
 0x47d   : > { %v3623_v61 = vadd.f32 %v4569_v59, %v945_v60  ;;  %v3375_v62 = vpop.f32.mrb[5].mxu1 }
 0x47e   : > { %v948_v63 = vpop.f32.mrb[6].mxu1 }
 0x47f   : > { %v3786_v1 = vpop.eup %3785  ;;  %v3141_v3 = vmul.f32 -1.442695, %v3623_v61  ;;  %v3376_v4 = vpop.f32.mrb[7].mxu1 }
 0x480   : > { %v1021_v5 = vadd.f32 1.0, %v3786_v1 }
 0x481   : > { %3787 = vpow2.f32 %v3141_v3 }
 0x482   : > { %3789 = vrcp.f32 %v1021_v5 }
 0x48b   : > { %v3788_v6 = vpop.eup %3787 }
 0x48c   : > { %v3790_v7 = vpop.eup %3789  ;;  %v955_v8 = vadd.f32 1.0, %v3788_v6 }
 0x48d   : > { %v1024_v10 = vmul.f32 2.0, %v3790_v7  ;;  %v1026_v22 = vmul.f32 %v3790_v7, %v4501_v32 }
 0x48e   : > { %3791 = vrcp.f32 %v955_v8 }
 0x48f   : > { %v3145_v13 = vadd.f32 -1.0, %v1024_v10 }
 0x491   : > { %1028 = vrot.lane.b32.xlu0 %v3145_v13, %s4128_s23 }
 0x498   : > { %v3792_v14 = vpop.eup %3791 }
 0x499   : > { %v958_v16 = vmul.f32 2.0, %v3792_v14  ;;  %v960_v25 = vmul.f32 0.0, %v3792_v14 }
 0x49b   : > { %v3142_v17 = vadd.f32 -1.0, %v958_v16 }
 0x49d   : > { %962 = vrot.lane.b32.xlu1 %v3142_v17, %s4128_s23 }
 0x503   : > { %v1029_v18 = vpop.permute.xlu0 %1028 }
 0x504   : > { %v1031_v19 = vmul.f32 %v3790_v7, %v1029_v18 }
 0x506   : > { %1033 = vrot.lane.b32.xlu0 %v1031_v19, %s4129_s27 }
 0x50f   : > { %v963_v20 = vpop.permute.xlu1 %962 }
 0x510   : > { %v965_v21 = vmul.f32 %v3792_v14, %v963_v20 }
 0x512   : > { %967 = vrot.lane.b32.xlu1 %v965_v21, %s4129_s27 }
 0x578   : > { %v1034_v23 = vpop.permute.xlu0 %1033 }
 0x579   : > { %v4577_v24 = vadd.f32 %v1034_v23, %v1026_v22 }
 0x57b   : > { %3793 = vtanh.f32 %v4577_v24 }
 0x584   : > { %v968_v26 = vpop.permute.xlu1 %967 }
 0x585   : > { %v3794_v27 = vpop.eup %3793  ;;  %v4580_v28 = vadd.f32 %v968_v26, %v960_v25 }
 0x586   : > { %1039 = vrot.lane.b32.xlu0 %v3794_v27, %s4128_s23 }
 0x587   : > { %3795 = vtanh.f32 %v4580_v28 }
 0x591   : > { %v3796_v29 = vpop.eup %3795 }
 0x592   : > { %973 = vrot.lane.b32.xlu1 %v3796_v29, %s4128_s23 }
 0x5f8   : > { %v1040_v30 = vpop.permute.xlu0 %1039 }
 0x5f9   : > { %v1042_v31 = vmul.f32 %v3790_v7, %v1040_v30 }
 0x5fb   : > { %v1043_v32 = vpack.c.bf16 %v1042_v31, %v1042_v31  ;;  %v733_v31 = vadd.f32 %v4495_v15, %v4490_v11 }
 0x5fd   : > { %1045 = vrot.lane.b32.xlu0 %v1043_v32, %s4129_s27 }
 0x604   : > { %v974_v33 = vpop.permute.xlu1 %973 }
 0x605   : > { %v4586_v34 = vmul.f32 %v3792_v14, %v974_v33 }
 0x607   : > { %v1090_v35 = vpack.c.bf16 %v4586_v34, %v4586_v34 }
 0x609   : > { %1092 = vrot.lane.b32.xlu1 %v1090_v35, %s4129_s27 }
 0x66f   : > { %v1046_v36 = vpop.permute.xlu0 %1045 }
 0x670   : > { %3390 = vmatmul.mubr.msk.bf16.vlgmr.msra.gmra.mrb[12].mxu0 %vm764_vm2, %v1046_v36  ;;  %3406 = vmatmul.mubr.msk.bf16.vlgmr.msra.gmra.mrb[8].mxu1 %vm764_vm2, %v1046_v36 }
 0x671   : > { %3394 = vmatpush3.bf16.msra.mxu0 %v4539_v49  ;;  %3397 = vmatprep.mubr.msk.bf16.mxu0 %vm4126_vm0, %v4125_v0 }
 0x672   : > { %3395 = vmatprep.subr.bf16.mxu0 %v4125_v0  ;;  %3410 = vmatpush3.bf16.msra.mxu1 %v4511_v38 }
 0x673   : > { %3411 = vmatprep.subr.bf16.mxu1 %v4125_v0  ;;  %3413 = vmatprep.mubr.msk.bf16.mxu1 %vm4126_vm0, %v4125_v0 }
 0x675   : > { %3396 = vmatpush3.bf16.msra.mxu0 %v4547_v51 }
 0x676   : > { %3425 = vmatprep.subr.bf16.mxu0 %v4125_v0  ;;  %3412 = vmatpush3.bf16.msra.mxu1 %v4518_v40 }
 0x677   : > { %3417 = vmatprep.subr.bf16.mxu1 %v4125_v0 }
 0x67b   : > { %v1093_v37 = vpop.permute.xlu1 %1092 }
 0x67c   : > { %3398 = vmatmul.mubr.msk.bf16.vlgmr.msra.gmra.mrb[12].mxu0 %vm764_vm2, %v1093_v37 }
 0x67d   : > { %3426 = vmatpush3.bf16.msra.mxu0 %v4465_v2  ;;  %3429 = vmatprep.mubr.msk.bf16.mxu0 %vm4126_vm0, %v4125_v0 }
 0x67e   : > { %3427 = vmatprep.subr.bf16.mxu0 %v4125_v0 }
 0x681   : > { %3428 = vmatpush3.bf16.msra.mxu0 %v4476_v9 }
 0x682   : > { %3433 = vmatprep.subr.bf16.mxu0 %v4125_v0 }
 0x743   : > { %v1197_v41 = vpop.f32.mrb[8].mxu1 }
 0x744   : > { %v1203_v42 = vadd.f32 %v1197_v41, %v730_v39  ;;  %v3407_v43 = vpop.f32.mrb[9].mxu1 }
 0x745   : > { %v1200_v44 = vpop.f32.mrb[10].mxu1 }
 0x746   : > { %v3151_v50 = vmul.f32 -1.442695, %v1203_v42  ;;  %v3408_v52 = vpop.f32.mrb[11].mxu1 }
 0x748   : > { %3797 = vpow2.f32 %v3151_v50 }
 0x74f   : > { %v1131_v53 = vpop.f32.mrb[12].mxu0 }
 0x750   : > { %v3624_v54 = vadd.f32 %v4569_v59, %v1131_v53  ;;  %v3399_v55 = vpop.f32.mrb[13].mxu0 }
 0x751   : > { %v1134_v56 = vpop.f32.mrb[14].mxu0 }
 0x752   : > { %v3798_v57 = vpop.eup %3797  ;;  %v3148_v58 = vmul.f32 -1.442695, %v3624_v54  ;;  %v3400_v60 = vpop.f32.mrb[15].mxu0 }
 0x753   : > { %v1207_v61 = vadd.f32 1.0, %v3798_v57 }
 0x754   : > { %3799 = vpow2.f32 %v3148_v58 }
 0x755   : > { %3801 = vrcp.f32 %v1207_v61 }
 0x75e   : > { %v3800_v62 = vpop.eup %3799 }
 0x75f   : > { %v3802_v12 = vpop.eup %3801  ;;  %v1141_v63 = vadd.f32 1.0, %v3800_v62 }
 0x760   : > { %v1210_v1 = vmul.f32 2.0, %v3802_v12  ;;  %v1212_v14 = vmul.f32 %v3802_v12, %v4577_v24 }
 0x761   : > { %3803 = vrcp.f32 %v1141_v63 }
 0x762   : > { %v3152_v3 = vadd.f32 -1.0, %v1210_v1 }
 0x764   : > { %1214 = vrot.lane.b32.xlu0 %v3152_v3, %s4128_s23 }
 0x76b   : > { %v3804_v4 = vpop.eup %3803 }
 0x76c   : > { %v1144_v5 = vmul.f32 2.0, %v3804_v4  ;;  %v1146_v18 = vmul.f32 %v3804_v4, %v4580_v28 }
 0x76e   : > { %v3149_v6 = vadd.f32 -1.0, %v1144_v5 }
 0x770   : > { %1148 = vrot.lane.b32.xlu1 %v3149_v6, %s4128_s23 }
 0x7d6   : > { %v1215_v7 = vpop.permute.xlu0 %1214 }
 0x7d7   : > { %v1217_v8 = vmul.f32 %v3802_v12, %v1215_v7 }
 0x7d9   : > { %1219 = vrot.lane.b32.xlu0 %v1217_v8, %s4129_s27 }
 0x7e2   : > { %v1149_v10 = vpop.permute.xlu1 %1148 }
 0x7e3   : > { %v1151_v13 = vmul.f32 %v3804_v4, %v1149_v10 }
 0x7e5   : > { %1153 = vrot.lane.b32.xlu1 %v1151_v13, %s4129_s27 }
 0x84b   : > { %v1220_v16 = vpop.permute.xlu0 %1219 }
 0x84c   : > { %v4620_v17 = vadd.f32 %v1220_v16, %v1212_v14 }
 0x84e   : > { %3805 = vtanh.f32 %v4620_v17 }
 0x857   : > { %v1154_v19 = vpop.permute.xlu1 %1153 }
 0x858   : > { %v3806_v20 = vpop.eup %3805  ;;  %v4624_v21 = vadd.f32 %v1154_v19, %v1146_v18 }
 0x859   : > { %1225 = vrot.lane.b32.xlu0 %v3806_v20, %s4128_s23 }
 0x85a   : > { %3807 = vtanh.f32 %v4624_v21 }
 0x864   : > { %v3808_v22 = vpop.eup %3807 }
 0x865   : > { %1159 = vrot.lane.b32.xlu1 %v3808_v22, %s4128_s23 }
 0x8cb   : > { %v1226_v23 = vpop.permute.xlu0 %1225 }
 0x8cc   : > { %v1228_v24 = vmul.f32 %v3802_v12, %v1226_v23 }
 0x8ce   : > { %v1229_v25 = vpack.c.bf16 %v1228_v24, %v1228_v24  ;;  %v738_v24 = vadd.f32 %v4490_v11, %v4530_v46 }
 0x8d0   : > { %1231 = vrot.lane.b32.xlu0 %v1229_v25, %s4129_s27 }
 0x8d7   : > { %v1160_v26 = vpop.permute.xlu1 %1159 }
 0x8d8   : > { %v4630_v27 = vmul.f32 %v3804_v4, %v1160_v26 }
 0x8da   : > { %v1276_v28 = vpack.c.bf16 %v4630_v27, %v4630_v27 }
 0x8dc   : > { %1278 = vrot.lane.b32.xlu1 %v1276_v28, %s4129_s27 }
 0x942   : > { %v1232_v29 = vpop.permute.xlu0 %1231 }
 0x943   : > { %3414 = vmatmul.mubr.msk.bf16.vlgmr.msra.gmra.mrb[12].mxu1 %vm764_vm2, %v1232_v29  ;;  %3430 = vmatmul.mubr.msk.bf16.vlgmr.msra.gmra.mrb[16].mxu0 %vm764_vm2, %v1232_v29 }
 0x944   : > { %3418 = vmatpush3.bf16.msra.mxu1 %v4539_v49  ;;  %3421 = vmatprep.mubr.msk.bf16.mxu1 %vm4126_vm0, %v4125_v0 }
 0x945   : > { %3419 = vmatprep.subr.bf16.mxu1 %v4125_v0  ;;  %3434 = vmatpush3.bf16.msra.mxu0 %v4511_v38 }
 0x946   : > { %3435 = vmatprep.subr.bf16.mxu0 %v4125_v0  ;;  %3437 = vmatprep.mubr.msk.bf16.mxu0 %vm4126_vm0, %v4125_v0 }
 0x948   : > { %3420 = vmatpush3.bf16.msra.mxu1 %v4547_v51 }
 0x949   : > { %3449 = vmatprep.subr.bf16.mxu1 %v4125_v0  ;;  %3436 = vmatpush3.bf16.msra.mxu0 %v4518_v40 }
 0x94a   : > { %3441 = vmatprep.subr.bf16.mxu0 %v4125_v0 }
 0x94e   : > { %v1279_v30 = vpop.permute.xlu1 %1278 }
 0x94f   : > { %3422 = vmatmul.mubr.msk.bf16.vlgmr.msra.gmra.mrb[12].mxu1 %vm764_vm2, %v1279_v30 }
 0x950   : > { %3450 = vmatpush3.bf16.msra.mxu1 %v4465_v2  ;;  %3453 = vmatprep.mubr.msk.bf16.mxu1 %vm4126_vm0, %v4125_v0 }
 0x951   : > { %3451 = vmatprep.subr.bf16.mxu1 %v4125_v0 }
 0x954   : > { %3452 = vmatpush3.bf16.msra.mxu1 %v4476_v9 }
 0x955   : > { %3457 = vmatprep.subr.bf16.mxu1 %v4125_v0 }
 0xa16   : > { %v1383_v32 = vpop.f32.mrb[16].mxu0 }
 0xa17   : > { %v1389_v33 = vadd.f32 %v1383_v32, %v733_v31  ;;  %v3431_v35 = vpop.f32.mrb[17].mxu0 }
 0xa18   : > { %v1386_v36 = vpop.f32.mrb[18].mxu0 }
 0xa19   : > { %v3158_v37 = vmul.f32 -1.442695, %v1389_v33  ;;  %v3432_v39 = vpop.f32.mrb[19].mxu0 }
 0xa1b   : > { %3809 = vpow2.f32 %v3158_v37 }
 0xa22   : > { %v1317_v41 = vpop.f32.mrb[12].mxu1 }
 0xa23   : > { %v3625_v42 = vadd.f32 %v4569_v59, %v1317_v41  ;;  %v3423_v43 = vpop.f32.mrb[13].mxu1 }
 0xa24   : > { %v1320_v44 = vpop.f32.mrb[14].mxu1 }
 0xa25   : > { %v3810_v50 = vpop.eup %3809  ;;  %v3155_v52 = vmul.f32 -1.442695, %v3625_v42  ;;  %v3424_v53 = vpop.f32.mrb[15].mxu1 }
 0xa26   : > { %v1393_v54 = vadd.f32 1.0, %v3810_v50 }
 0xa27   : > { %3811 = vpow2.f32 %v3155_v52 }
 0xa28   : > { %3813 = vrcp.f32 %v1393_v54 }
 0xa31   : > { %v3812_v55 = vpop.eup %3811 }
 0xa32   : > { %v3814_v15 = vpop.eup %3813  ;;  %v1327_v56 = vadd.f32 1.0, %v3812_v55 }
 0xa33   : > { %v1396_v57 = vmul.f32 2.0, %v3814_v15  ;;  %v1398_v4 = vmul.f32 %v3814_v15, %v4620_v17 }
 0xa34   : > { %3815 = vrcp.f32 %v1327_v56 }
 0xa35   : > { %v3159_v58 = vadd.f32 -1.0, %v1396_v57 }
 0xa37   : > { %1400 = vrot.lane.b32.xlu0 %v3159_v58, %s4128_s23 }
 0xa3e   : > { %v3816_v60 = vpop.eup %3815 }
 0xa3f   : > { %v1330_v61 = vmul.f32 2.0, %v3816_v60  ;;  %v1332_v7 = vmul.f32 %v3816_v60, %v4624_v21 }
 0xa41   : > { %v3156_v62 = vadd.f32 -1.0, %v1330_v61 }
 0xa43   : > { %1334 = vrot.lane.b32.xlu1 %v3156_v62, %s4128_s23 }
 0xaa9   : > { %v1401_v12 = vpop.permute.xlu0 %1400 }
 0xaaa   : > { %v1403_v63 = vmul.f32 %v3814_v15, %v1401_v12 }
 0xaac   : > { %1405 = vrot.lane.b32.xlu0 %v1403_v63, %s4129_s27 }
 0xab5   : > { %v1335_v1 = vpop.permute.xlu1 %1334 }
 0xab6   : > { %v1337_v3 = vmul.f32 %v3816_v60, %v1335_v1 }
 0xab8   : > { %1339 = vrot.lane.b32.xlu1 %v1337_v3, %s4129_s27 }
 0xb1e   : > { %v1406_v5 = vpop.permute.xlu0 %1405 }
 0xb1f   : > { %v4664_v6 = vadd.f32 %v1406_v5, %v1398_v4 }
 0xb21   : > { %3817 = vtanh.f32 %v4664_v6 }
 0xb2a   : > { %v1340_v8 = vpop.permute.xlu1 %1339 }
 0xb2b   : > { %v3818_v10 = vpop.eup %3817  ;;  %v4668_v13 = vadd.f32 %v1340_v8, %v1332_v7 }
 0xb2c   : > { %1411 = vrot.lane.b32.xlu0 %v3818_v10, %s4128_s23 }
 0xb2d   : > { %3819 = vtanh.f32 %v4668_v13 }
 0xb37   : > { %v3820_v14 = vpop.eup %3819 }
 0xb38   : > { %1345 = vrot.lane.b32.xlu1 %v3820_v14, %s4128_s23 }
 0xb9e   : > { %v1412_v16 = vpop.permute.xlu0 %1411 }
 0xb9f   : > { %v1414_v17 = vmul.f32 %v3814_v15, %v1412_v16 }
 0xba1   : > { %v1415_v18 = vpack.c.bf16 %v1414_v17, %v1414_v17  ;;  %v741_v17 = vadd.f32 %v4490_v11, %v4534_v48 }
 0xba3   : > { %1417 = vrot.lane.b32.xlu0 %v1415_v18, %s4129_s27 }
 0xbaa   : > { %v1346_v19 = vpop.permute.xlu1 %1345 }
 0xbab   : > { %v4674_v20 = vmul.f32 %v3816_v60, %v1346_v19 }
 0xbad   : > { %v1462_v21 = vpack.c.bf16 %v4674_v20, %v4674_v20 }
 0xbaf   : > { %1464 = vrot.lane.b32.xlu1 %v1462_v21, %s4129_s27 }
 0xc15   : > { %v1418_v22 = vpop.permute.xlu0 %1417 }
 0xc16   : > { %3438 = vmatmul.mubr.msk.bf16.vlgmr.msra.gmra.mrb[20].mxu0 %vm764_vm2, %v1418_v22  ;;  %3454 = vmatmul.mubr.msk.bf16.vlgmr.msra.gmra.mrb[16].mxu1 %vm764_vm2, %v1418_v22 }
 0xc17   : > { %3442 = vmatpush3.bf16.msra.mxu0 %v4539_v49  ;;  %3445 = vmatprep.mubr.msk.bf16.mxu0 %vm4126_vm0, %v4125_v0 }
 0xc18   : > { %3443 = vmatprep.subr.bf16.mxu0 %v4125_v0  ;;  %3458 = vmatpush3.bf16.msra.mxu1 %v4511_v38 }
 0xc19   : > { %3459 = vmatprep.subr.bf16.mxu1 %v4125_v0  ;;  %3461 = vmatprep.mubr.msk.bf16.mxu1 %vm4126_vm0, %v4125_v0 }
 0xc1b   : > { %3444 = vmatpush3.bf16.msra.mxu0 %v4547_v51 }
 0xc1c   : > { %3473 = vmatprep.subr.bf16.mxu0 %v4125_v0  ;;  %3460 = vmatpush3.bf16.msra.mxu1 %v4518_v40 }
 0xc1d   : > { %3465 = vmatprep.subr.bf16.mxu1 %v4125_v0 }
 0xc21   : > { %v1465_v23 = vpop.permute.xlu1 %1464 }
 0xc22   : > { %3446 = vmatmul.mubr.msk.bf16.vlgmr.msra.gmra.mrb[20].mxu0 %vm764_vm2, %v1465_v23 }
 0xc23   : > { %3474 = vmatpush3.bf16.msra.mxu0 %v4465_v2  ;;  %3477 = vmatprep.mubr.msk.bf16.mxu0 %vm4126_vm0, %v4125_v0 }
 0xc24   : > { %3475 = vmatprep.subr.bf16.mxu0 %v4125_v0 }
 0xc27   : > { %3476 = vmatpush3.bf16.msra.mxu0 %v4476_v9 }
 0xc28   : > { %3481 = vmatprep.subr.bf16.mxu0 %v4125_v0 }
 0xce9   : > { %v1569_v25 = vpop.f32.mrb[16].mxu1 }
 0xcea   : > { %v1575_v26 = vadd.f32 %v1569_v25, %v738_v24  ;;  %v3455_v28 = vpop.f32.mrb[17].mxu1 }
 0xceb   : > { %v1572_v29 = vpop.f32.mrb[18].mxu1 }
 0xcec   : > { %v3165_v30 = vmul.f32 -1.442695, %v1575_v26  ;;  %v3456_v31 = vpop.f32.mrb[19].mxu1 }
 0xcee   : > { %3821 = vpow2.f32 %v3165_v30 }
 0xcf5   : > { %v1503_v32 = vpop.f32.mrb[20].mxu0 }
 0xcf6   : > { %v3626_v33 = vadd.f32 %v4569_v59, %v1503_v32  ;;  %v3447_v35 = vpop.f32.mrb[21].mxu0 }
 0xcf7   : > { %v1506_v36 = vpop.f32.mrb[22].mxu0 }
 0xcf8   : > { %v3822_v37 = vpop.eup %3821  ;;  %v3162_v39 = vmul.f32 -1.442695, %v3626_v33  ;;  %v3448_v41 = vpop.f32.mrb[23].mxu0 }
 0xcf9   : > { %v1579_v42 = vadd.f32 1.0, %v3822_v37 }
 0xcfa   : > { %3823 = vpow2.f32 %v3162_v39 }
 0xcfb   : > { %3825 = vrcp.f32 %v1579_v42 }
 0xd04   : > { %v3824_v43 = vpop.eup %3823 }
 0xd05   : > { %v3826_v46 = vpop.eup %3825  ;;  %v1513_v44 = vadd.f32 1.0, %v3824_v43 }
 0xd06   : > { %v1582_v50 = vmul.f32 2.0, %v3826_v46  ;;  %v1584_v60 = vmul.f32 %v3826_v46, %v4664_v6 }
 0xd07   : > { %3827 = vrcp.f32 %v1513_v44 }
 0xd08   : > { %v3166_v52 = vadd.f32 -1.0, %v1582_v50 }
 0xd0a   : > { %1586 = vrot.lane.b32.xlu0 %v3166_v52, %s4128_s23 }
 0xd11   : > { %v3828_v53 = vpop.eup %3827 }
 0xd12   : > { %v1516_v54 = vmul.f32 2.0, %v3828_v53  ;;  %v1518_v12 = vmul.f32 %v3828_v53, %v4668_v13 }
 0xd14   : > { %v3163_v55 = vadd.f32 -1.0, %v1516_v54 }
 0xd16   : > { %1520 = vrot.lane.b32.xlu1 %v3163_v55, %s4128_s23 }
 0xd7c   : > { %v1587_v15 = vpop.permute.xlu0 %1586 }
 0xd7d   : > { %v1589_v56 = vmul.f32 %v3826_v46, %v1587_v15 }
 0xd7f   : > { %1591 = vrot.lane.b32.xlu0 %v1589_v56, %s4129_s27 }
 0xd88   : > { %v1521_v57 = vpop.permute.xlu1 %1520 }
 0xd89   : > { %v1523_v58 = vmul.f32 %v3828_v53, %v1521_v57 }
 0xd8b   : > { %1525 = vrot.lane.b32.xlu1 %v1523_v58, %s4129_s27 }
 0xdf1   : > { %v1592_v61 = vpop.permute.xlu0 %1591 }
 0xdf2   : > { %v4708_v62 = vadd.f32 %v1592_v61, %v1584_v60 }
 0xdf4   : > { %3829 = vtanh.f32 %v4708_v62 }
 0xdfd   : > { %v1526_v63 = vpop.permute.xlu1 %1525 }
 0xdfe   : > { %v3830_v1 = vpop.eup %3829  ;;  %v4712_v3 = vadd.f32 %v1526_v63, %v1518_v12 }
 0xdff   : > { %1597 = vrot.lane.b32.xlu0 %v3830_v1, %s4128_s23 }
 0xe00   : > { %3831 = vtanh.f32 %v4712_v3 }
 0xe0a   : > { %v3832_v4 = vpop.eup %3831 }
 0xe0b   : > { %1531 = vrot.lane.b32.xlu1 %v3832_v4, %s4128_s23 }
 0xe71   : > { %v1598_v5 = vpop.permute.xlu0 %1597 }
 0xe72   : > { %v1600_v6 = vmul.f32 %v3826_v46, %v1598_v5 }
 0xe74   : > { %v1601_v7 = vpack.c.bf16 %v1600_v6, %v1600_v6  ;;  %v746_v6 = vadd.f32 %v4528_v45, %v4490_v11 }
 0xe76   : > { %1603 = vrot.lane.b32.xlu0 %v1601_v7, %s4129_s27 }
 0xe7d   : > { %v1532_v8 = vpop.permute.xlu1 %1531 }
 0xe7e   : > { %v4718_v10 = vmul.f32 %v3828_v53, %v1532_v8 }
 0xe80   : > { %v1648_v13 = vpack.c.bf16 %v4718_v10, %v4718_v10 }
 0xe82   : > { %1650 = vrot.lane.b32.xlu1 %v1648_v13, %s4129_s27 }
 0xee8   : > { %v1604_v14 = vpop.permute.xlu0 %1603 }
 0xee9   : > { %3462 = vmatmul.mubr.msk.bf16.vlgmr.msra.gmra.mrb[20].mxu1 %vm764_vm2, %v1604_v14  ;;  %3478 = vmatmul.mubr.msk.bf16.vlgmr.msra.gmra.mrb[24].mxu0 %vm764_vm2, %v1604_v14 }
 0xeea   : > { %3466 = vmatpush3.bf16.msra.mxu1 %v4539_v49  ;;  %3469 = vmatprep.mubr.msk.bf16.mxu1 %vm4126_vm0, %v4125_v0 }
 0xeeb   : > { %3467 = vmatprep.subr.bf16.mxu1 %v4125_v0  ;;  %3482 = vmatpush3.bf16.msra.mxu0 %v4511_v38 }
 0xeec   : > { %3483 = vmatprep.subr.bf16.mxu0 %v4125_v0  ;;  %3485 = vmatprep.mubr.msk.bf16.mxu0 %vm4126_vm0, %v4125_v0 }
 0xeee   : > { %3468 = vmatpush3.bf16.msra.mxu1 %v4547_v51 }
 0xeef   : > { %3497 = vmatprep.subr.bf16.mxu1 %v4125_v0  ;;  %3484 = vmatpush3.bf16.msra.mxu0 %v4518_v40 }
 0xef0   : > { %3489 = vmatprep.subr.bf16.mxu0 %v4125_v0 }
 0xef4   : > { %v1651_v16 = vpop.permute.xlu1 %1650 }
 0xef5   : > { %3470 = vmatmul.mubr.msk.bf16.vlgmr.msra.gmra.mrb[20].mxu1 %vm764_vm2, %v1651_v16 }
 0xef6   : > { %3498 = vmatpush3.bf16.msra.mxu1 %v4465_v2  ;;  %3501 = vmatprep.mubr.msk.bf16.mxu1 %vm4126_vm0, %v4125_v0 }
 0xef7   : > { %3499 = vmatprep.subr.bf16.mxu1 %v4125_v0 }
 0xefa   : > { %3500 = vmatpush3.bf16.msra.mxu1 %v4476_v9 }
 0xefb   : > { %3505 = vmatprep.subr.bf16.mxu1 %v4125_v0 }
 0xfbc   : > { %v1755_v18 = vpop.f32.mrb[24].mxu0 }
 0xfbd   : > { %v1761_v19 = vadd.f32 %v1755_v18, %v741_v17  ;;  %v3479_v21 = vpop.f32.mrb[25].mxu0 }
 0xfbe   : > { %v1758_v22 = vpop.f32.mrb[26].mxu0 }
 0xfbf   : > { %v3172_v23 = vmul.f32 -1.442695, %v1761_v19  ;;  %v3480_v24 = vpop.f32.mrb[27].mxu0 }
 0xfc1   : > { %3833 = vpow2.f32 %v3172_v23 }
 0xfc8   : > { %v1689_v25 = vpop.f32.mrb[20].mxu1 }
 0xfc9   : > { %v3627_v26 = vadd.f32 %v4569_v59, %v1689_v25  ;;  %v3471_v28 = vpop.f32.mrb[21].mxu1 }
 0xfca   : > { %v1692_v29 = vpop.f32.mrb[22].mxu1 }
 0xfcb   : > { %v3834_v30 = vpop.eup %3833  ;;  %v3169_v31 = vmul.f32 -1.442695, %v3627_v26  ;;  %v3472_v32 = vpop.f32.mrb[23].mxu1 }
 0xfcc   : > { %v1765_v33 = vadd.f32 1.0, %v3834_v30 }
 0xfcd   : > { %3835 = vpow2.f32 %v3169_v31 }
 0xfce   : > { %3837 = vrcp.f32 %v1765_v33 }
 0xfd7   : > { %v3836_v35 = vpop.eup %3835 }
 0xfd8   : > { %v3838_v48 = vpop.eup %3837  ;;  %v1699_v36 = vadd.f32 1.0, %v3836_v35 }
 0xfd9   : > { %v1768_v37 = vmul.f32 2.0, %v3838_v48  ;;  %v1770_v53 = vmul.f32 %v3838_v48, %v4708_v62 }
 0xfda   : > { %3839 = vrcp.f32 %v1699_v36 }
 0xfdb   : > { %v3173_v39 = vadd.f32 -1.0, %v1768_v37 }
 0xfdd   : > { %1772 = vrot.lane.b32.xlu0 %v3173_v39, %s4128_s23 }
 0xfe4   : > { %v3840_v41 = vpop.eup %3839 }
 0xfe5   : > { %v1702_v42 = vmul.f32 2.0, %v3840_v41  ;;  %v1704_v15 = vmul.f32 %v3840_v41, %v4712_v3 }
 0xfe7   : > { %v3170_v43 = vadd.f32 -1.0, %v1702_v42 }
 0xfe9   : > { %1706 = vrot.lane.b32.xlu1 %v3170_v43, %s4128_s23 }
0x104f   : > { %v1773_v46 = vpop.permute.xlu0 %1772 }
0x1050   : > { %v1775_v44 = vmul.f32 %v3838_v48, %v1773_v46 }
0x1052   : > { %1777 = vrot.lane.b32.xlu0 %v1775_v44, %s4129_s27 }
0x105b   : > { %v1707_v50 = vpop.permute.xlu1 %1706 }
0x105c   : > { %v1709_v52 = vmul.f32 %v3840_v41, %v1707_v50 }
0x105e   : > { %1711 = vrot.lane.b32.xlu1 %v1709_v52, %s4129_s27 }
0x10c4   : > { %v1778_v54 = vpop.permute.xlu0 %1777 }
0x10c5   : > { %v4752_v55 = vadd.f32 %v1778_v54, %v1770_v53 }
0x10c7   : > { %3841 = vtanh.f32 %v4752_v55 }
0x10d0   : > { %v1712_v56 = vpop.permute.xlu1 %1711 }
0x10d1   : > { %v3842_v57 = vpop.eup %3841  ;;  %v4756_v58 = vadd.f32 %v1712_v56, %v1704_v15 }
0x10d2   : > { %1783 = vrot.lane.b32.xlu0 %v3842_v57, %s4128_s23 }
0x10d3   : > { %3843 = vtanh.f32 %v4756_v58 }
0x10dd   : > { %v3844_v60 = vpop.eup %3843 }
0x10de   : > { %1717 = vrot.lane.b32.xlu1 %v3844_v60, %s4128_s23 }
0x1144   : > { %v1784_v61 = vpop.permute.xlu0 %1783 }
0x1145   : > { %v1786_v62 = vmul.f32 %v3838_v48, %v1784_v61 }
0x1147   : > { %v1787_v12 = vpack.c.bf16 %v1786_v62, %v1786_v62 }
0x1149   : > { %1789 = vrot.lane.b32.xlu0 %v1787_v12, %s4129_s27 }
0x1150   : > { %v1718_v63 = vpop.permute.xlu1 %1717 }
0x1151   : > { %v4762_v1 = vmul.f32 %v3840_v41, %v1718_v63 }
0x1153   : > { %v1834_v3 = vpack.c.bf16 %v4762_v1, %v4762_v1 }
0x1155   : > { %1836 = vrot.lane.b32.xlu1 %v1834_v3, %s4129_s27 }
0x11bb   : > { %v1790_v4 = vpop.permute.xlu0 %1789 }
0x11bc   : > { %3486 = vmatmul.mubr.msk.bf16.vlgmr.msra.gmra.mrb[28].mxu0 %vm764_vm2, %v1790_v4  ;;  %3502 = vmatmul.mubr.msk.bf16.vlgmr.msra.gmra.mrb[24].mxu1 %vm764_vm2, %v1790_v4 }
0x11bd   : > { %3490 = vmatpush3.bf16.msra.mxu0 %v4539_v49  ;;  %3493 = vmatprep.mubr.msk.bf16.mxu0 %vm4126_vm0, %v4125_v0 }
0x11be   : > { %3491 = vmatprep.subr.bf16.mxu0 %v4125_v0  ;;  %3506 = vmatpush3.bf16.msra.mxu1 %v4511_v38 }
0x11bf   : > { %3507 = vmatprep.subr.bf16.mxu1 %v4125_v0  ;;  %3509 = vmatprep.mubr.msk.bf16.mxu1 %vm4126_vm0, %v4125_v0 }
0x11c1   : > { %3492 = vmatpush3.bf16.msra.mxu0 %v4547_v51 }
0x11c2   : > { %3521 = vmatprep.subr.bf16.mxu0 %v4125_v0  ;;  %3508 = vmatpush3.bf16.msra.mxu1 %v4518_v40 }
0x11c3   : > { %3513 = vmatprep.subr.bf16.mxu1 %v4125_v0 }
0x11c7   : > { %v1837_v5 = vpop.permute.xlu1 %1836 }
0x11c8   : > { %3494 = vmatmul.mubr.msk.bf16.vlgmr.msra.gmra.mrb[28].mxu0 %vm764_vm2, %v1837_v5 }
0x11c9   : > { %3522 = vmatpush3.bf16.msra.mxu0 %v4465_v2  ;;  %3525 = vmatprep.mubr.msk.bf16.mxu0 %vm4126_vm0, %v4125_v0 }
0x11ca   : > { %3523 = vmatprep.subr.bf16.mxu0 %v4125_v0 }
0x11cd   : > { %3524 = vmatpush3.bf16.msra.mxu0 %v4476_v9 }
0x11ce   : > { %3529 = vmatprep.subr.bf16.mxu0 %v4125_v0 }
0x128f   : > { %v1941_v7 = vpop.f32.mrb[24].mxu1 }
0x1290   : > { %v1947_v8 = vadd.f32 %v1941_v7, %v746_v6  ;;  %v3503_v13 = vpop.f32.mrb[25].mxu1 }
0x1291   : > { %v1944_v14 = vpop.f32.mrb[26].mxu1 }
0x1292   : > { %v3179_v16 = vmul.f32 -1.442695, %v1947_v8  ;;  %v3504_v17 = vpop.f32.mrb[27].mxu1 }
0x1294   : > { %3845 = vpow2.f32 %v3179_v16 }
0x129b   : > { %v1875_v2 = vpop.f32.mrb[28].mxu0 }
0x129c   : > { %v3628_v18 = vadd.f32 %v4569_v59, %v1875_v2  ;;  %v3495_v19 = vpop.f32.mrb[29].mxu0 }
0x129d   : > { %v1878_v21 = vpop.f32.mrb[30].mxu0 }
0x129e   : > { %v3846_v22 = vpop.eup %3845  ;;  %v3176_v23 = vmul.f32 -1.442695, %v3628_v18  ;;  %v3496_v9 = vpop.f32.mrb[31].mxu0 }
0x129f   : > { %v1951_v24 = vadd.f32 1.0, %v3846_v22 }
0x12a0   : > { %3847 = vpow2.f32 %v3176_v23 }
0x12a1   : > { %3849 = vrcp.f32 %v1951_v24 }
0x12aa   : > { %v3848_v25 = vpop.eup %3847 }
0x12ab   : > { %v3850_v11 = vpop.eup %3849  ;;  %v1885_v45 = vadd.f32 1.0, %v3848_v25 }
0x12ac   : > { %v1954_v26 = vmul.f32 2.0, %v3850_v11  ;;  %v1956_v36 = vmul.f32 %v3850_v11, %v4752_v55 }
0x12ad   : > { %3851 = vrcp.f32 %v1885_v45 }
0x12ae   : > { %v3180_v28 = vadd.f32 -1.0, %v1954_v26 }
0x12b0   : > { %1958 = vrot.lane.b32.xlu0 %v3180_v28, %s4128_s23 }
0x12b7   : > { %v3852_v29 = vpop.eup %3851 }
0x12b8   : > { %v1888_v30 = vmul.f32 2.0, %v3852_v29  ;;  %v1890_v41 = vmul.f32 %v3852_v29, %v4756_v58 }
0x12ba   : > { %v3177_v31 = vadd.f32 -1.0, %v1888_v30 }
0x12bc   : > { %1892 = vrot.lane.b32.xlu1 %v3177_v31, %s4128_s23 }
0x1322   : > { %v1959_v32 = vpop.permute.xlu0 %1958 }
0x1323   : > { %v1961_v33 = vmul.f32 %v3850_v11, %v1959_v32 }
0x1325   : > { %1963 = vrot.lane.b32.xlu0 %v1961_v33, %s4129_s27 }
0x132e   : > { %v1893_v35 = vpop.permute.xlu1 %1892 }
0x132f   : > { %v1895_v48 = vmul.f32 %v3852_v29, %v1893_v35 }
0x1331   : > { %1897 = vrot.lane.b32.xlu1 %v1895_v48, %s4129_s27 }
0x1397   : > { %v1964_v37 = vpop.permute.xlu0 %1963 }
0x1398   : > { %v4796_v39 = vadd.f32 %v1964_v37, %v1956_v36 }
0x139a   : > { %3853 = vtanh.f32 %v4796_v39 }
0x13a3   : > { %v1898_v42 = vpop.permute.xlu1 %1897 }
0x13a4   : > { %v3854_v43 = vpop.eup %3853  ;;  %v4800_v46 = vadd.f32 %v1898_v42, %v1890_v41  ;;  %v3895_v41 = vld [vmem:[%s4988_s5 + $0x8] sm:$0xff]  }
0x13a5   : > { %1969 = vrot.lane.b32.xlu0 %v3854_v43, %s4128_s23 }
0x13a6   : > { %3855 = vtanh.f32 %v4800_v46 }
0x13b0   : > { %v3856_v44 = vpop.eup %3855 }
0x13b1   : > { %1903 = vrot.lane.b32.xlu1 %v3856_v44, %s4128_s23 }
0x1417   : > { %v1970_v50 = vpop.permute.xlu0 %1969 }
0x1418   : > { %v1972_v52 = vmul.f32 %v3850_v11, %v1970_v50 }
0x141a   : > { %v1973_v53 = vpack.c.bf16 %v1972_v52, %v1972_v52 }
0x141c   : > { %1975 = vrot.lane.b32.xlu0 %v1973_v53, %s4129_s27 }
0x1423   : > { %v1904_v54 = vpop.permute.xlu1 %1903 }
0x1424   : > { %v4806_v55 = vmul.f32 %v3852_v29, %v1904_v54 }
0x1426   : > { %v2020_v15 = vpack.c.bf16 %v4806_v55, %v4806_v55 }
0x1428   : > { %2022 = vrot.lane.b32.xlu1 %v2020_v15, %s4129_s27 }
0x148e   : > { %v1976_v56 = vpop.permute.xlu0 %1975 }
0x148f   : > { %3510 = vmatmul.mubr.msk.bf16.vlgmr.msra.gmra.mrb[28].mxu1 %vm764_vm2, %v1976_v56  ;;  %3526 = vmatmul.mubr.msk.bf16.vlgmr.msra.gmra.mrb[32].mxu0 %vm764_vm2, %v1976_v56 }
0x1490   : > { %3514 = vmatpush3.bf16.msra.mxu1 %v4539_v49  ;;  %3517 = vmatprep.mubr.msk.bf16.mxu1 %vm4126_vm0, %v4125_v0 }
0x1491   : > { %3515 = vmatprep.subr.bf16.mxu1 %v4125_v0  ;;  %3530 = vmatpush3.bf16.msra.mxu0 %v4511_v38  ;;  %v3893_v38 = vld [vmem:[#allocation6] ss:$0 sm:$0xff] }
0x1492   : > { %3531 = vmatprep.subr.bf16.mxu0 %v4125_v0  ;;  %3533 = vmatprep.mubr.msk.bf16.mxu0 %vm4126_vm0, %v4125_v0  ;;  %v749_v57 = vadd.f32 %v3893_v38, %v4532_v47 }
0x1494   : > { %3516 = vmatpush3.bf16.msra.mxu1 %v4547_v51 }
0x1495   : > { %3532 = vmatpush3.bf16.msra.mxu0 %v4518_v40  ;;  %3545 = vmatprep.subr.bf16.mxu1 %v4125_v0 }
0x1496   : > { %3537 = vmatprep.subr.bf16.mxu0 %v4125_v0 }
0x149a   : > { %v2023_v49 = vpop.permute.xlu1 %2022 }
0x149b   : > { %3518 = vmatmul.mubr.msk.bf16.vlgmr.msra.gmra.mrb[28].mxu1 %vm764_vm2, %v2023_v49 }
0x149c   : > { %3549 = vmatprep.mubr.msk.bf16.mxu1 %vm4126_vm0, %v4125_v0 }
0x1562   : > { %v2127_v58 = vpop.f32.mrb[32].mxu0 }
0x1563   : > { %v2133_v60 = vadd.f32 %v2127_v58, %v749_v57  ;;  %v3527_v61 = vpop.f32.mrb[33].mxu0 }
0x1564   : > { %v2130_v62 = vpop.f32.mrb[34].mxu0 }
0x1565   : > { %v3186_v51 = vmul.f32 -1.442695, %v2133_v60  ;;  %v3528_v12 = vpop.f32.mrb[35].mxu0 }
0x1566   : > { %v3772_v12 = vld [vmem:[%s4990_s7 + $0x8] sm:$0xff]  }
0x1567   : > { %3857 = vpow2.f32 %v3186_v51  ;;  %v3771_v51 = vld [vmem:[%s4990_s7] sm:$0xff]  }
0x1568   : > { %3546 = vmatpush3.bf16.msra.mxu1 %v3771_v51 }
0x1569   : > { %3547 = vmatprep.subr.bf16.mxu1 %v4125_v0 }
0x156c   : > { %3548 = vmatpush3.bf16.msra.mxu1 %v3772_v12 }
0x156e   : > { %v2061_v40 = vpop.f32.mrb[28].mxu1 }
0x156f   : > { %v3629_v63 = vadd.f32 %v4569_v59, %v2061_v40  ;;  %v3519_v3 = vpop.f32.mrb[29].mxu1  ;;  %v2349_v40 = vpack.c.bf16 %v4630_v27, %v4586_v34  ;;  %v2350_v34 = vpack.c.bf16 %v4718_v10, %v4674_v20 }
0x1570   : > { %v2064_v4 = vpop.f32.mrb[30].mxu1  ;;  %v2351_v3 = vpack.c.bf16 %v4806_v55, %v4762_v1  ;;  %v3774_v1 = vld [vmem:[%s5036_s16 + $0x8] sm:$0xff]  }
0x1571   : > { %v3858_v5 = vpop.eup %3857  ;;  %v3183_v6 = vmul.f32 -1.442695, %v3629_v63  ;;  %v3520_v7 = vpop.f32.mrb[31].mxu1  ;;  %v3773_v63 = vld [vmem:[%s5036_s16] sm:$0xff]  }
0x1572   : > { %v2137_v8 = vadd.f32 1.0, %v3858_v5  ;;  %3553 = vmatprep.subr.bf16.mxu1 %v3773_v63 }
0x1573   : > { %3859 = vpow2.f32 %v3183_v6 }
0x1574   : > { %3861 = vrcp.f32 %v2137_v8 }
0x157d   : > { %v3860_v13 = vpop.eup %3859 }
0x157e   : > { %v3862_v47 = vpop.eup %3861  ;;  %v2071_v14 = vadd.f32 1.0, %v3860_v13  ;;  %v2473_v13 = vld [vmem:[%s5037_s12] sm:$0xff] }
0x157f   : > { %v2140_v16 = vmul.f32 2.0, %v3862_v47  ;;  %v2142_v24 = vmul.f32 %v3862_v47, %v4796_v39  ;;  %v3894_v39 = vld [vmem:[%s4988_s5] sm:$0xff]  }
0x1580   : > { %3863 = vrcp.f32 %v2071_v14 }
0x1581   : > { %v3187_v17 = vadd.f32 -1.0, %v2140_v16  ;;  %v2475_v16 = vld [vmem:[%s5037_s12 + $0x10] sm:$0xff] }
0x1583   : > { %2144 = vrot.lane.b32.xlu0 %v3187_v17, %s4128_s23  ;;  %v2476_v17 = vld [vmem:[%s5037_s12 + $0x18] sm:$0xff] }
0x158a   : > { %v3864_v2 = vpop.eup %3863 }
0x158b   : > { %v2074_v18 = vmul.f32 2.0, %v3864_v2  ;;  %v2076_v45 = vmul.f32 %v3864_v2, %v4800_v46 }
0x158d   : > { %v3184_v19 = vadd.f32 -1.0, %v2074_v18 }
0x158f   : > { %2078 = vrot.lane.b32.xlu1 %v3184_v19, %s4128_s23 }
0x15f5   : > { %v2145_v21 = vpop.permute.xlu0 %2144 }
0x15f6   : > { %v2147_v22 = vmul.f32 %v3862_v47, %v2145_v21 }
0x15f8   : > { %2149 = vrot.lane.b32.xlu0 %v2147_v22, %s4129_s27 }
0x1601   : > { %v2079_v23 = vpop.permute.xlu1 %2078 }
0x1602   : > { %v2081_v9 = vmul.f32 %v3864_v2, %v2079_v23  ;;  %v3192_v23 = vld [vmem:[#allocation9] ss:$0 sm:$0xff] }
0x1604   : > { %2083 = vrot.lane.b32.xlu1 %v2081_v9, %s4129_s27  ;;  %v3196_v9 = vld [vmem:[%s5038_s17] ss:$0 sm:$0xff] }
0x166a   : > { %v2150_v25 = vpop.permute.xlu0 %2149 }
0x166b   : > { %v2152_v11 = vadd.f32 %v2150_v25, %v2142_v24 }
0x166d   : > { %3865 = vtanh.f32 %v2152_v11 }
0x1676   : > { %v2084_v26 = vpop.permute.xlu1 %2083 }
0x1677   : > { %v3866_v28 = vpop.eup %3865  ;;  %v2086_v29 = vadd.f32 %v2084_v26, %v2076_v45 }
0x1678   : > { %2155 = vrot.lane.b32.xlu0 %v3866_v28, %s4128_s23 }
0x1679   : > { %3867 = vtanh.f32 %v2086_v29 }
0x1683   : > { %v3868_v30 = vpop.eup %3867 }
0x1684   : > { %2089 = vrot.lane.b32.xlu1 %v3868_v30, %s4128_s23 }
0x16ea   : > { %v2156_v31 = vpop.permute.xlu0 %2155 }
0x16eb   : > { %v2158_v32 = vmul.f32 %v3862_v47, %v2156_v31  ;;  %v2474_v47 = vld [vmem:[%s5037_s12 + $0x8] sm:$0xff] }
0x16ec   : > { %v3615_v14 = vpack.c.bf16 %v2474_v47, %v2473_v13 }
0x16ed   : > { %v2159_v33 = vpack.c.bf16 %v2158_v32, %v2158_v32 }
0x16ef   : > { %2161 = vrot.lane.b32.xlu0 %v2159_v33, %s4129_s27 }
0x16f6   : > { %v2090_v35 = vpop.permute.xlu1 %2089 }
0x16f7   : > { %v2092_v48 = vmul.f32 %v3864_v2, %v2090_v35  ;;  %v3619_v2 = vpack.c.bf16 %v2476_v17, %v2475_v16 }
0x16f9   : > { %v2206_v36 = vpack.c.bf16 %v2092_v48, %v2092_v48 }
0x16fb   : > { %2208 = vrot.lane.b32.xlu1 %v2206_v36, %s4129_s27 }
0x1761   : > { %v2162_v37 = vpop.permute.xlu0 %2161 }
0x1762   : > { %3534 = vmatmul.mubr.msk.bf16.vlgmr.msra.gmra.mrb[36].mxu0 %vm764_vm2, %v2162_v37 }
0x1763   : > { %3538 = vmatpush3.bf16.msra.mxu0 %v3894_v39  ;;  %3541 = vmatprep.mubr.msk.bf16.mxu0 %vm4126_vm0, %v4125_v0 }
0x1764   : > { %3539 = vmatprep.subr.bf16.mxu0 %v4125_v0 }
0x1767   : > { %3540 = vmatpush3.bf16.msra.mxu0 %v3895_v41 }
0x1768   : > { %3616 = vmatprep.subr.bf16.mxu0 %v3615_v14 }
0x176d   : > { %v2209_v42 = vpop.permute.xlu1 %2208 }
0x176e   : > { %3542 = vmatmul.mubr.msk.bf16.vlgmr.msra.gmra.mrb[36].mxu0 %vm764_vm2, %v2209_v42 }
0x176f   : > { %3618 = vmatpush3.bf16.msra.mxu0 %v3615_v14 }
0x1770   : > { %3620 = vmatprep.subr.bf16.mxu0 %v3619_v2 }
0x1773   : > { %3622 = vmatpush3.bf16.msra.mxu0 %v3619_v2 }
0x1774   : > { %3599 = vmatprep.subr.bf16.mxu0 %v4125_v0 }
0x1841   : > { %v2247_v43 = vpop.f32.mrb[36].mxu0 }
0x1842   : > { %v3630_v46 = vadd.f32 %v4569_v59, %v2247_v43  ;;  %v3543_v44 = vpop.f32.mrb[37].mxu0 }
0x1843   : > { %v2250_v50 = vpop.f32.mrb[38].mxu0 }
0x1844   : > { %v3190_v52 = vmul.f32 -1.442695, %v3630_v46  ;;  %v3544_v53 = vpop.f32.mrb[39].mxu0 }
0x1846   : > { %3869 = vpow2.f32 %v3190_v52 }
0x1850   : > { %v3870_v54 = vpop.eup %3869 }
0x1851   : > { %v2257_v15 = vadd.f32 1.0, %v3870_v54 }
0x1853   : > { %3871 = vrcp.f32 %v2257_v15 }
0x185d   : > { %v3872_v56 = vpop.eup %3871 }
0x185e   : > { %v2260_v49 = vmul.f32 2.0, %v3872_v56  ;;  %v2262_v60 = vmul.f32 %v3872_v56, %v2086_v29 }
0x1860   : > { %v3191_v38 = vadd.f32 -1.0, %v2260_v49 }
0x1862   : > { %2264 = vrot.lane.b32.xlu0 %v3191_v38, %s4128_s23 }
0x18d4   : > { %v2265_v57 = vpop.permute.xlu0 %2264 }
0x18d5   : > { %v2267_v58 = vmul.f32 %v3872_v56, %v2265_v57 }
0x18d7   : > { %2269 = vrot.lane.b32.xlu1 %v2267_v58, %s4129_s27 }
0x1949   : > { %v2270_v61 = vpop.permute.xlu1 %2269 }
0x194a   : > { %v2272_v59 = vadd.f32 %v2270_v61, %v2262_v60 }
0x194c   : > { %3873 = vtanh.f32 %v2272_v59 }
0x1956   : > { %v3874_v62 = vpop.eup %3873 }
0x1957   : > { %2275 = vrot.lane.b32.xlu0 %v3874_v62, %s4128_s23  ;;  %s5042_s23 = sld [smem:[#allocation22_spill]] }
0x195b   : > { %2368 = vrot.lane.b32.xlu0 %v2349_v40, %s4129_s27 }
0x195f   : > { %2372 = vrot.lane.b32.xlu0 %v2351_v3, %s4129_s27 }
0x19c9   : > { %v2276_v4 = vpop.permute.xlu0 %2275 }
0x19ca   : > { %v2278_v5 = vmul.f32 %v3872_v56, %v2276_v4 }
0x19cc   : > { %v2279_v6 = vpack.c.bf16 %v2278_v5, %v2278_v5  ;;  %v2352_v27 = vpack.c.bf16 %v2278_v5, %v2092_v48 }
0x19cd   : > { %v2369_v7 = vpop.permute.xlu0 %2368 }
0x19ce   : > { %2292 = vrot.lane.b32.xlu1 %v2279_v6, %s4129_s27 }
0x19d1   : > { %v2373_v20 = vpop.permute.xlu0 %2372 }
0x19d2   : > { %2370 = vrot.lane.b32.xlu1 %v2350_v34, %s4129_s27 }
0x19d6   : > { %2374 = vrot.lane.b32.xlu1 %v2352_v27, %s4129_s27  ;;  %s5039_s27 = sld [smem:[#allocation24_spill]] }
0x19dc   : > { %v2670_v15 = vld [vmem:[%s5039_s27] sm:$0xf] }
0x1a40   : > { %v2293_v55 = vpop.permute.xlu1 %2292 }
0x1a41   : > { %3550 = vmatmul.mubr.msk.bf16.vlgmr.msra.gmra.mrb[32].mxu1 %vm764_vm2, %v2293_v55 }
0x1a42   : > { %3554 = vmatpush3.bf16.msra.mxu1 %v3773_v63  ;;  %3557 = vmatprep.mubr.msk.bf16.mxu1 %vm764_vm2, %v2369_v7 }
0x1a43   : > { %3555 = vmatprep.subr.bf16.mxu1 %v3774_v1 }
0x1a44   : > { %v2371_v8 = vpop.permute.xlu1 %2370 }
0x1a46   : > { %3556 = vmatpush3.bf16.msra.mxu1 %v3774_v1 }
0x1a47   : > { %3585 = vmatprep.subr.msk.mxu1 %vm2695_vm3, %v2670_v15 }
0x1a48   : > { %v2375_v10 = vpop.permute.xlu1 %2374 }
0x1a49   : > { %3558 = vmatmul.mubr.msk.bf16.vlgmr.msra.gmra.mrb[36].mxu1 %vm764_vm2, %v2371_v8 }
0x1a4a   : > { %3561 = vmatprep.mubr.msk.bf16.mxu1 %vm764_vm2, %v2373_v20  ;;  %3586 = vmatpush3.msk.msra.mxu1 %vm2695_vm3, %v2670_v15 }
0x1a51   : > { %3562 = vmatmul.mubr.msk.bf16.gmra.mrb[40].mxu1 %vm764_vm2, %v2375_v10 }
0x1b14   : > { %v2343_v18 = vpop.f32.mrb[32].mxu1 }
0x1b15   : > { %v3551_v19 = vpop.f32.mrb[33].mxu1  ;;  %v2344_v25 = vadd.f32 %v3192_v23, %v2343_v18 }
0x1b16   : > { %v2346_v21 = vpop.f32.mrb[34].mxu1 }
0x1b17   : > { %v3552_v22 = vpop.f32.mrb[35].mxu1 }
0x1b1c   : > { %v3559_v24 = vpop.f32.mrb[36].mxu1 }
0x1b1d   : > { %v2443_v11 = vadd.f32 %v3559_v24, %v3196_v9  ;;  %v2434_v45 = vpop.f32.mrb[37].mxu1 }
0x1b1e   : > { %v2435_v26 = vadd.f32 %v3196_v9, %v2434_v45  ;;  %v3560_v28 = vpop.f32.mrb[38].mxu1 }
0x1b1f   : > { %v2467_v29 = vmul.f32 %v2443_v11, %v2344_v25  ;;  %v2446_v30 = vadd.f32 %v3560_v28, %v3196_v9  ;;  %v2437_v31 = vpop.f32.mrb[39].mxu1 }
0x1b20   : > { %v2465_v32 = vmul.f32 %v2435_v26, %v2344_v25  ;;  %v2438_v33 = vadd.f32 %v3196_v9, %v2437_v31  ;;  %2812 = vrot.lane.b32.xlu0 %v2435_v26, %s4130_s15 }
0x1b21   : > { %v2468_v35 = vmul.f32 %v2446_v30, %v2344_v25 }
0x1b22   : > { %v2466_v48 = vmul.f32 %v2438_v33, %v2344_v25  ;;  %2814 = vrot.lane.b32.xlu1 %v2438_v33, %s4130_s15  ;;  %3573 = vmatprep.mubr.msk.f32.mxu0 %vm764_vm2, %v2465_v32 }
0x1b24   : > { %v3563_v36 = vpop.f32.mrb[40].mxu1  ;;  %2816 = vrot.lane.b32.xlu0 %v2443_v11, %s4130_s15  ;;  %3574 = vmatmul.mubr.msk.f32.vlgmr.msra.gmra.mrb[40].mxu0 %vm764_vm2, %v2466_v48 }
0x1b25   : > { %v2459_v37 = vadd.f32 %v3563_v36, %v3196_v9  ;;  %v2450_v39 = vpop.f32.mrb[41].mxu1  ;;  %3576 = vmatprep.mubr.msk.f32.mxu0 %vm764_vm2, %v2467_v29 }
0x1b26   : > { %v2451_v41 = vadd.f32 %v3196_v9, %v2450_v39  ;;  %v3564_v42 = vpop.f32.mrb[42].mxu1  ;;  %2818 = vrot.lane.b32.xlu1 %v2446_v30, %s4130_s15 }
0x1b27   : > { %v2471_v43 = vmul.f32 %v2459_v37, %v2344_v25  ;;  %v2462_v46 = vadd.f32 %v3564_v42, %v3196_v9  ;;  %v2453_v44 = vpop.f32.mrb[43].mxu1 }
0x1b28   : > { %v2469_v50 = vmul.f32 %v2451_v41, %v2344_v25  ;;  %v2454_v52 = vadd.f32 %v3196_v9, %v2453_v44  ;;  %2820 = vrot.lane.b32.xlu0 %v2451_v41, %s4130_s15  ;;  %3577 = vmatmul.mubr.msk.f32.gmra.mrb[42].mxu0 %vm764_vm2, %v2468_v35 }
0x1b29   : > { %v2472_v53 = vmul.f32 %v2462_v46, %v2344_v25 }
0x1b2a   : > { %v2470_v54 = vmul.f32 %v2454_v52, %v2344_v25  ;;  %2822 = vrot.lane.b32.xlu1 %v2454_v52, %s4130_s15  ;;  %3579 = vmatprep.mubr.msk.f32.mxu0 %vm764_vm2, %v2469_v50 }
0x1b2c   : > { %2824 = vrot.lane.b32.xlu0 %v2459_v37, %s4130_s15  ;;  %3580 = vmatmul.mubr.msk.f32.gmra.mrb[44].mxu0 %vm764_vm2, %v2470_v54 }
0x1b2d   : > { %3582 = vmatprep.mubr.msk.f32.mxu0 %vm764_vm2, %v2471_v43 }
0x1b2e   : > { %2826 = vrot.lane.b32.xlu1 %v2462_v46, %s4130_s15 }
0x1b30   : > { %3583 = vmatmul.mubr.msk.f32.gmra.mrb[46].mxu0 %vm764_vm2, %v2472_v53 }
0x1b31   : > { %3603 = vmatprep.mubr.msk.bf16.mxu0 %vm4126_vm0, %v4125_v0 }
0x1bf7   : > { %v3575_v56 = vpop.f32.mrb[40].mxu0 }
0x1bf8   : > { %v2567_v49 = vpop.f32.mrb[41].mxu0  ;;  %v2608_v60 = vsel %vm2606_vm4, %v3575_v56, -inf }
0x1bf9   : > { %v2607_v62 = vsel %vm2606_vm4, %v2567_v49, -inf }
0x1bfb   : > { %v3578_v38 = vpop.f32.mrb[42].mxu0 }
0x1bfc   : > { %v2577_v57 = vpop.f32.mrb[43].mxu0  ;;  %v2610_v3 = vsel %vm2606_vm4, %v3578_v38, -inf }
0x1bfd   : > { %v2609_v34 = vsel %vm2606_vm4, %v2577_v57, -inf }
0x1bff   : > { %v3581_v58 = vpop.f32.mrb[44].mxu0 }
0x1c00   : > { %v2613_v61 = vsel %vm2606_vm4, %v3581_v58, -inf  ;;  %v2587_v59 = vpop.f32.mrb[45].mxu0 }
0x1c01   : > { %v2614_v51 = vmax.f32 %v2608_v60, %v2613_v61  ;;  %v2611_v12 = vsel %vm2606_vm4, %v2587_v59, -inf }
0x1c02   : > { %v2612_v40 = vmax.f32 %v2607_v62, %v2611_v12  ;;  %v3775_v62 = vld [vmem:[#allocation10] sm:$0xff]   ;;  %v2813_v12 = vpop.permute.xlu0 %2812 }
0x1c03   : > { %v3584_v63 = vpop.f32.mrb[46].mxu0  ;;  %3600 = vmatpush3.bf16.msra.mxu0 %v3775_v62 }
0x1c04   : > { %v2619_v4 = vmax.f32 %v2612_v40, %v2614_v51  ;;  %v2617_v5 = vsel %vm2606_vm4, %v3584_v63, -inf  ;;  %v2597_v6 = vpop.f32.mrb[47].mxu0  ;;  %3601 = vmatprep.subr.bf16.mxu0 %v4125_v0  ;;  %v3776_v51 = vld [vmem:[#allocation10 + $0x8] sm:$0xff]   ;;  %v2815_v40 = vpop.permute.xlu1 %2814 }
0x1c05   : > { %v2618_v27 = vmax.f32 %v2610_v3, %v2617_v5  ;;  %v2615_v1 = vsel %vm2606_vm4, %v2597_v6, -inf }
0x1c06   : > { %v2616_v55 = vmax.f32 %v2609_v34, %v2615_v1 }
0x1c07   : > { %3602 = vmatpush3.bf16.msra.mxu0 %v3776_v51 }
0x1c08   : > { %v2620_v7 = vmax.f32 %v2616_v55, %v2618_v27  ;;  %3607 = vmatprep.subr.bf16.mxu0 %v4125_v0 }
0x1c0a   : > { %v2621_v8 = vmax.f32 %v2619_v4, %v2620_v7  ;;  %v2819_v4 = vpop.permute.xlu1 %2818 }
0x1c0c   : > { %v2622_v20 = vsub.f32 %v2567_v49, %v2621_v8  ;;  %v2623_v10 = vsub.f32 %v3575_v56, %v2621_v8  ;;  %v2624_v13 = vsub.f32 %v2577_v57, %v2621_v8  ;;  %v2625_v47 = vsub.f32 %v3578_v38, %v2621_v8 }
0x1c0d   : > { %v2626_v14 = vsub.f32 %v2587_v59, %v2621_v8  ;;  %v2627_v16 = vsub.f32 %v3581_v58, %v2621_v8  ;;  %v2628_v17 = vsub.f32 %v2597_v6, %v2621_v8  ;;  %v2629_v2 = vsub.f32 %v3584_v63, %v2621_v8  ;;  %v2817_v63 = vpop.permute.xlu0 %2816 }
0x1c0e   : > { %v2630_v18 = vmul.f32 1.442695, %v2622_v20  ;;  %v2632_v19 = vmul.f32 1.442695, %v2623_v10  ;;  %v2634_v21 = vmul.f32 1.442695, %v2624_v13 }
0x1c0f   : > { %v2636_v22 = vmul.f32 1.442695, %v2625_v47  ;;  %v2638_v23 = vmul.f32 1.442695, %v2626_v14  ;;  %v2640_v9 = vmul.f32 1.442695, %v2627_v16  ;;  %v2823_v47 = vpop.permute.xlu1 %2822 }
0x1c10   : > { %3875 = vpow2.f32 %v2630_v18  ;;  %v2642_v24 = vmul.f32 1.442695, %v2628_v17  ;;  %v2644_v25 = vmul.f32 1.442695, %v2629_v2 }
0x1c11   : > { %3877 = vpow2.f32 %v2632_v19  ;;  %v2821_v20 = vpop.permute.xlu0 %2820 }
0x1c12   : > { %3879 = vpow2.f32 %v2634_v21 }
0x1c13   : > { %3881 = vpow2.f32 %v2636_v22 }
0x1c14   : > { %3883 = vpow2.f32 %v2638_v23 }
0x1c15   : > { %3885 = vpow2.f32 %v2640_v9  ;;  %v2825_v23 = vpop.permute.xlu0 %2824 }
0x1c16   : > { %3887 = vpow2.f32 %v2642_v24 }
0x1c17   : > { %3889 = vpow2.f32 %v2644_v25  ;;  %v2827_v25 = vpop.permute.xlu1 %2826 }
0x1c1a   : > { %v3876_v11 = vpop.eup %3875 }
0x1c1b   : > { %v3878_v45 = vpop.eup %3877  ;;  %v2646_v26 = vsel %vm2606_vm4, %v3876_v11, 0.0 }
0x1c1c   : > { %v3880_v28 = vpop.eup %3879  ;;  %v2647_v29 = vsel %vm2606_vm4, %v3878_v45, 0.0 }
0x1c1d   : > { %v3882_v30 = vpop.eup %3881  ;;  %v2648_v31 = vadd.f32 %v2647_v29, %v2646_v26  ;;  %v2649_v32 = vsel %vm2606_vm4, %v3880_v28, 0.0 }
0x1c1e   : > { %v3884_v33 = vpop.eup %3883  ;;  %v2651_v48 = vsel %vm2606_vm4, %v3882_v30, 0.0 }
0x1c1f   : > { %v2650_v35 = vadd.f32 %v2649_v32, %v2648_v31  ;;  %v3886_v36 = vpop.eup %3885  ;;  %v2653_v39 = vsel %vm2606_vm4, %v3884_v33, 0.0 }
0x1c20   : > { %v3888_v41 = vpop.eup %3887  ;;  %v2655_v43 = vsel %vm2606_vm4, %v3886_v36, 0.0 }
0x1c21   : > { %v2652_v37 = vadd.f32 %v2651_v48, %v2650_v35  ;;  %v3890_v46 = vpop.eup %3889  ;;  %v2657_v50 = vsel %vm2606_vm4, %v3888_v41, 0.0  ;;  %v3777_v48 = vld [vmem:[%s5040_s21] sm:$0xff]  }
0x1c22   : > { %v2659_v53 = vsel %vm2606_vm4, %v3890_v46, 0.0 }
0x1c23   : > { %v2654_v42 = vadd.f32 %v2653_v39, %v2652_v37  ;;  %v3778_v37 = vld [vmem:[%s5040_s21 + $0x8] sm:$0xff]   ;;  %v3220_v39 = vld [vmem:[%s5041_s10] ss:$0 sm:$0xff] }
0x1c25   : > { %v2656_v44 = vadd.f32 %v2655_v43, %v2654_v42 }
0x1c27   : > { %v2658_v52 = vadd.f32 %v2657_v50, %v2656_v44 }
0x1c29   : > { %v2660_v54 = vadd.f32 %v2659_v53, %v2658_v52 }
0x1c2b   : > { %3891 = vrcp.f32 %v2660_v54 }
0x1c35   : > { %v3892_v15 = vpop.eup %3891 }
0x1c36   : > { %v2662_v56 = vmul.f32 %v3892_v15, %v3876_v11  ;;  %v2663_v49 = vmul.f32 %v3892_v15, %v3878_v45  ;;  %v2664_v38 = vmul.f32 %v3892_v15, %v3880_v28  ;;  %v2665_v57 = vmul.f32 %v3892_v15, %v3882_v30 }
0x1c37   : > { %v2666_v58 = vmul.f32 %v3892_v15, %v3884_v33  ;;  %v2667_v60 = vmul.f32 %v3892_v15, %v3886_v36  ;;  %v2668_v61 = vmul.f32 %v3892_v15, %v3888_v41  ;;  %v2669_v59 = vmul.f32 %v3892_v15, %v3890_v46 }
0x1c38   : > { %3587 = vmatprep.mubr.msk.f32.mxu1 %vm2606_vm4, %v2662_v56 }
0x1c39   : > { %3588 = vmatmul.mubr.msk.f32.vlgmr.msra.gmra.mrb[44].mxu1 %vm2606_vm4, %v2663_v49 }
0x1c3a   : > { %3590 = vmatprep.mubr.msk.f32.mxu1 %vm2606_vm4, %v2664_v38 }
0x1c3d   : > { %3591 = vmatmul.mubr.msk.f32.gmra.mrb[46].mxu1 %vm2606_vm4, %v2665_v57 }
0x1c3e   : > { %3593 = vmatprep.mubr.msk.f32.mxu1 %vm2606_vm4, %v2666_v58 }
0x1c41   : > { %3594 = vmatmul.mubr.msk.f32.gmra.mrb[48].mxu1 %vm2606_vm4, %v2667_v60 }
0x1c42   : > { %3596 = vmatprep.mubr.msk.f32.mxu1 %vm2606_vm4, %v2668_v61 }
0x1c45   : > { %3597 = vmatmul.mubr.msk.f32.gmra.mrb[50].mxu1 %vm2606_vm4, %v2669_v59 }
0x1d0c   : > { %v3589_v3 = vpop.f32.mrb[44].mxu1 }
0x1d0d   : > { %v2837_v5 = vmul.f32 %v3589_v3, %v2815_v40  ;;  %v2765_v6 = vpop.f32.mrb[45].mxu1 }
0x1d0e   : > { %v2836_v34 = vmul.f32 %v2813_v12, %v2765_v6 }
0x1d0f   : > { %v2845_v27 = vsel %vm764_vm2, %v2837_v5, 0.0 }
0x1d10   : > { %v2844_v1 = vsel %vm764_vm2, %v2836_v34, 0.0  ;;  %v3592_v55 = vpop.f32.mrb[46].mxu1 }
0x1d11   : > { %v2846_v7 = vadd.f32 %v2845_v27, %v2844_v1  ;;  %v2775_v8 = vpop.f32.mrb[47].mxu1  ;;  %v2839_v10 = vmul.f32 %v3592_v55, %v2819_v4 }
0x1d12   : > { %v2838_v13 = vmul.f32 %v2817_v63, %v2775_v8 }
0x1d13   : > { %v2849_v18 = vsel %vm764_vm2, %v2839_v10, 0.0 }
0x1d14   : > { %v2847_v14 = vsel %vm764_vm2, %v2838_v13, 0.0  ;;  %v3595_v16 = vpop.f32.mrb[48].mxu1 }
0x1d15   : > { %v2848_v17 = vadd.f32 %v2847_v14, %v2846_v7  ;;  %v2785_v2 = vpop.f32.mrb[49].mxu1  ;;  %v2841_v19 = vmul.f32 %v3595_v16, %v2823_v47 }
0x1d16   : > { %v2840_v21 = vmul.f32 %v2821_v20, %v2785_v2 }
0x1d17   : > { %v2850_v22 = vadd.f32 %v2849_v18, %v2848_v17  ;;  %v2853_v26 = vsel %vm764_vm2, %v2841_v19, 0.0 }
0x1d18   : > { %v2851_v9 = vsel %vm764_vm2, %v2840_v21, 0.0  ;;  %v3598_v24 = vpop.f32.mrb[50].mxu1 }
0x1d19   : > { %v2852_v11 = vadd.f32 %v2851_v9, %v2850_v22  ;;  %v2795_v45 = vpop.f32.mrb[51].mxu1  ;;  %v2843_v28 = vmul.f32 %v3598_v24, %v2827_v25 }
0x1d1a   : > { %v2842_v29 = vmul.f32 %v2825_v23, %v2795_v45 }
0x1d1b   : > { %v2854_v30 = vadd.f32 %v2853_v26, %v2852_v11  ;;  %v2857_v33 = vsel %vm764_vm2, %v2843_v28, 0.0 }
0x1d1c   : > { %v2855_v31 = vsel %vm764_vm2, %v2842_v29, 0.0 }
0x1d1d   : > { %v2856_v32 = vadd.f32 %v2855_v31, %v2854_v30 }
0x1d1f   : > { %v2858_v35 = vadd.f32 %v2857_v33, %v2856_v32 }
0x1d21   : > { %v2859_v36 = vpack.c.bf16 %v2858_v35, %v2858_v35 }
0x1d23   : > { %3604 = vmatmul.mubr.msk.bf16.vlgmr.msra.gmra.mrb[48].mxu0 %vm764_vm2, %v2859_v36 }
0x1d24   : > { %3608 = vmatpush3.bf16.msra.mxu0 %v3777_v48  ;;  %3611 = vmatprep.mubr.msk.bf16.mxu0 %vm4126_vm0, %v4125_v0 }
0x1d25   : > { %3609 = vmatprep.subr.bf16.mxu0 %v4125_v0  ;;  %v3224_v0 = vld [vmem:[%s5042_s23] ss:$0 sm:$0xff] }
0x1d28   : > { %3610 = vmatpush3.bf16.msra.mxu0 %v3778_v37 }
0x1df6   : > { %v2920_v41 = vpop.f32.mrb[48].mxu0 }
0x1df7   : > { %v2921_v42 = vadd.f32 %v3220_v39, %v2920_v41  ;;  %v3605_v43 = vpop.f32.mrb[49].mxu0 }
0x1df8   : > { %v2923_v46 = vpop.f32.mrb[50].mxu0 }
0x1df9   : > { %v2926_v44 = vpack.c.bf16 %v2921_v42, %v2921_v42  ;;  %v3606_v50 = vpop.f32.mrb[51].mxu0 }
0x1dfb   : > { %3612 = vmatmul.mubr.msk.bf16.vlgmr.msra.gmra.mrb[52].mxu0 %vm764_vm2, %v2926_v44 }
0x1ece   : > { %v2987_v52 = vpop.f32.mrb[52].mxu0 }
0x1ecf   : > { %v2988_v53 = vadd.f32 %v3224_v0, %v2987_v52  ;;  %v3613_v54 = vpop.f32.mrb[53].mxu0 }
0x1ed0   : > { %v2990_v15 = vpop.f32.mrb[54].mxu0 }
0x1ed1   : > { %2993 = vst.msk [vmem:[%s632_s18] sm:$0xff] %vm2606_vm4, %v2988_v53  ;;  %v3614_v56 = vpop.f32.mrb[55].mxu0 }
0x1ed2 PF: > { %p30_p13 = scmp.ge.s32.totalorder %s4385_s13, 4   ;;  %s5044_s24 = smov %s4104_s25 }
0x1ed3   : > { %s5045_s25 = smov %s4108_s26  ;;  %s5046_s26 = smov %s4395_s14 }
0x1ed4   : > { %s5047_s27 = smov %s4385_s13  ;;  %32 = sbr.rel (!%p30_p13) target bundleno = 17 (0x11), region = 148 }
0x1edb   :  { %3013 = vsyncpa [#allocation3], 1 }
0x1edc   :  { %3015 = vsyncpa [#allocation3 + $0x1], 1 }
0x1edd   :  { %3016 = vsyncpa [#allocation5], 1 }
0x1ede   :  { %3017 = vsyncpa [#allocation8], 1 }
0x1edf   :  { %3018 = vsyncpa [#allocation11], 1 }

</bundles_post_ra>
